<compile_context>
chip_gen: v7x
topology: tpu7x:2x2x1
jax: 0.10.0
libtpu: 0.0.40
codegen_flags: <defaults>
</compile_context>

<pallas_src>
import jax
import jax.numpy as jnp
from jax.experimental import pallas as pl
from jax.experimental.pallas import tpu as pltpu


# ----------------------------- Pallas kernel -------------------------------

def make_fused_lstm_kernel(num_layers, T, B, H):
    """num_layers LSTM layers (lane-packed gates) + linear head, one call."""

    def kernel(*refs):
        x_ref, h0_ref, c0_ref = refs[0], refs[1], refs[2]
        idx = 3
        layer_refs = []
        for _ in range(num_layers):
            layer_refs.append((refs[idx], refs[idx + 1], refs[idx + 2]))
            idx += 3
        wlin_ref, blin_ref = refs[idx], refs[idx + 1]
        out_ref, hn_ref, cn_ref = refs[idx + 2], refs[idx + 3], refs[idx + 4]

        # ---- loop-invariant loads (hoisted out of the unrolled recurrence) --
        wih = [layer_refs[l][0][...] for l in range(num_layers)]   # (D_l, 4H)
        whh = [layer_refs[l][1][...] for l in range(num_layers)]   # (H, 4H)
        bias = [layer_refs[l][2][...] for l in range(num_layers)]  # (1, 4H)
        wlin = wlin_ref[...]                                       # (H, O)
        blin = blin_ref[...]                                       # (1, O)

        # Layer-0 input projection hoisted over ALL T steps: one lane-dense
        # (T*B, D) @ (D, 4H) matmul; gates packed [i|f|g|o] along 4H lanes.
        xw0 = jnp.dot(x_ref[...], wih[0],
                      preferred_element_type=jnp.float32) + bias[0]

        def cell(gates, c_prev):
            # PyTorch gate order [i, f, g, o] along the packed 4H lane axis.
            i_g = jax.nn.sigmoid(gates[:, 0 * H:1 * H])
            f_g = jax.nn.sigmoid(gates[:, 1 * H:2 * H])
            g_g = jnp.tanh(gates[:, 2 * H:3 * H])
            o_g = jax.nn.sigmoid(gates[:, 3 * H:4 * H])
            c_new = f_g * c_prev + i_g * g_g
            h_new = o_g * jnp.tanh(c_new)
            return h_new, c_new

        h = [h0_ref[l] for l in range(num_layers)]    # (B, H) per layer, vregs
        c = [c0_ref[l] for l in range(num_layers)]
        y = [[None] * T for _ in range(num_layers)]   # per-step outputs, vregs

        # ---- wavefront over (layer, time): layer l runs step t at w = t + l.
        # The num_layers cells per wave are independent dependent-matmul
        # chains, hiding MXU push->pop latency of the strictly serial
        # h-recurrence.  Loop is fully unrolled (T, L tiny) -> one basic block,
        # full LLO scheduler visibility.
        for w in range(T + num_layers - 1):
            for l in range(num_layers):
                t = w - l
                if t < 0 or t >= T:
                    continue
                if l == 0:
                    gates = xw0[t * B:(t + 1) * B, :] + jnp.dot(
                        h[0], whh[0], preferred_element_type=jnp.float32)
                else:
                    # y_{l-1,t} @ W_ih is independent of the h-chain -> its
                    # MXU latency is hidden behind the recurrent dot.
                    gates = (jnp.dot(y[l - 1][t], wih[l],
                                     preferred_element_type=jnp.float32)
                             + jnp.dot(h[l], whh[l],
                                       preferred_element_type=jnp.float32)
                             + bias[l])
                h[l], c[l] = cell(gates, c[l])
                y[l][t] = h[l]

        for l in range(num_layers):
            hn_ref[l] = h[l]
            cn_ref[l] = c[l]

        # Linear head straight from vregs (time-major rows); tiny output, so
        # per-step masked stores are negligible (lane-pad O only if it grows).
        last = num_layers - 1
        for t in range(T):
            out_ref[t * B:(t + 1) * B, :] = (
                jnp.dot(y[last][t], wlin, preferred_element_type=jnp.float32)
                + blin).astype(out_ref.dtype)

    return kernel


# ------------------------------ JAX wrapper ---------------------------------

@jax.jit
def lstm_forward(x, h0, c0, params):
    """Matches LSTM.forward: x (B, T, D), h0/c0 (L, B, H) -> (out, (hn, cn))."""
    B, T, D = x.shape
    L, _, H = h0.shape
    w_lin, b_lin = params["linear"]              # (H, O), (1, O)
    O = w_lin.shape[1]

    # Time-major, flattened: (T*B, D). Only this cheap transpose runs in XLA.
    x_tm = jnp.transpose(x, (1, 0, 2)).reshape(T * B, D)

    inputs = [x_tm, h0, c0]
    for l in range(L):
        inputs.extend(params["lstm"][l])         # (D_l, 4H), (H, 4H), (1, 4H)
    inputs.extend([w_lin, b_lin])

    # Advisory cost estimate (XLA scheduling hint only).
    H4 = 4 * H
    flops = (2 * T * B * D * H4                  # layer-0 hoisted projection
             + 2 * T * B * H * H4                # layer-0 recurrent matmuls
             + (L - 1) * (4 * T * B * H * H4)    # layers>=1: input + recurrent
             + 2 * T * B * H * O                 # linear head
             + 12 * L * T * B * H)               # gate elementwise (approx)
    transcendentals = 5 * L * T * B * H          # 3 sigmoid + 2 tanh per cell
    bytes_accessed = (sum(4 * a.size for a in inputs)
                      + 4 * (T * B * O + 2 * L * B * H))

    kernel = make_fused_lstm_kernel(L, T, B, H)
    out_flat, hn, cn = pl.pallas_call(
        kernel,
        out_shape=(jax.ShapeDtypeStruct((T * B, O), jnp.float32),
                   jax.ShapeDtypeStruct((L, B, H), jnp.float32),
                   jax.ShapeDtypeStruct((L, B, H), jnp.float32)),
        compiler_params=pltpu.CompilerParams(
            vmem_limit_bytes=32 * 1024 * 1024),
        cost_estimate=pl.CostEstimate(flops=flops,
                                      transcendentals=transcendentals,
                                      bytes_accessed=bytes_accessed),
    )(*inputs)

    out = jnp.transpose(out_flat.reshape(T, B, O), (1, 0, 2))   # (B, T, O)
    return out, (hn, cn)


# --------------------------- reference (pure JAX) ---------------------------

def ref_forward(x, h0, c0, raw_lstm, w_lin_raw, b_lin_raw):
    B, T, _ = x.shape
    L, _, H = h0.shape
    layer_in = x
    hns, cns = [], []
    for l in range(L):
        w_ih, w_hh, b_ih, b_hh = raw_lstm[l]      # PyTorch layout: (4H, D)/(4H, H)
        h, c = h0[l], c0[l]
        ys = []
        for t in range(T):
            g = layer_in[:, t, :] @ w_ih.T + h @ w_hh.T + b_ih + b_hh
            i_g = jax.nn.sigmoid(g[:, :H])
            f_g = jax.nn.sigmoid(g[:, H:2 * H])
            g_g = jnp.tanh(g[:, 2 * H:3 * H])
            o_g = jax.nn.sigmoid(g[:, 3 * H:])
            c = f_g * c + i_g * g_g
            h = o_g * jnp.tanh(c)
            ys.append(h)
        layer_in = jnp.stack(ys, axis=1)
        hns.append(h)
        cns.append(c)
    out = layer_in.reshape(B * T, H) @ w_lin_raw.T + b_lin_raw
    return out.reshape(B, T, -1), jnp.stack(hns), jnp.stack(cns)


# ---------------------------------- main ------------------------------------

if __name__ == "__main__":
    INPUT_FNUM = 4
    HIDDEN = 32
    OUTPUT_FNUM = 4
    NUM_LAYERS = 2
    B, T = 2, 8

    key = jax.random.PRNGKey(0)
    keys = jax.random.split(key, 4 * NUM_LAYERS + 5)

    # LSTM params: PyTorch init normal(0, 0.001), gate order [i, f, g, o].
    # Kernel packing: gates lane-packed along the 4H axis:
    #   W_ih -> (D_in, 4H), W_hh -> (H, 4H), bias (b_ih + b_hh) -> (1, 4H).
    raw_lstm = []
    lstm_params = []
    ki = 0
    for l in range(NUM_LAYERS):
        d_in = INPUT_FNUM if l == 0 else HIDDEN
        w_ih = 0.001 * jax.random.normal(keys[ki + 0], (4 * HIDDEN, d_in), jnp.float32)
        w_hh = 0.001 * jax.random.normal(keys[ki + 1], (4 * HIDDEN, HIDDEN), jnp.float32)
        b_ih = 0.001 * jax.random.normal(keys[ki + 2], (4 * HIDDEN,), jnp.float32)
        b_hh = 0.001 * jax.random.normal(keys[ki + 3], (4 * HIDDEN,), jnp.float32)
        raw_lstm.append((w_ih, w_hh, b_ih, b_hh))
        wih_packed = w_ih.T                                   # (d_in, 4H)
        whh_packed = w_hh.T                                   # (H, 4H)
        b_packed = (b_ih + b_hh).reshape(1, 4 * HIDDEN)       # (1, 4H)
        lstm_params.append((wih_packed, whh_packed, b_packed))
        ki += 4

    # Linear head (deterministic synthetic init); kernel stores W.T / (1, O).
    w_lin_raw = 0.1 * jax.random.normal(keys[ki + 0], (OUTPUT_FNUM, HIDDEN), jnp.float32)
    b_lin_raw = 0.1 * jax.random.normal(keys[ki + 1], (OUTPUT_FNUM,), jnp.float32)
    params = {"lstm": lstm_params,
              "linear": (w_lin_raw.T, b_lin_raw.reshape(1, OUTPUT_FNUM))}

    x = jax.random.normal(keys[ki + 2], (B, T, INPUT_FNUM), jnp.float32)
    h0 = 0.01 * jax.random.normal(keys[ki + 3], (NUM_LAYERS, B, HIDDEN), jnp.float32)
    c0 = 0.01 * jax.random.normal(keys[ki + 4], (NUM_LAYERS, B, HIDDEN), jnp.float32)

    out, (hn, cn) = lstm_forward(x, h0, c0, params)
    jax.block_until_ready((out, hn, cn))

    out_ref, hn_ref, cn_ref = ref_forward(x, h0, c0, raw_lstm, w_lin_raw, b_lin_raw)
    assert out.shape == (B, T, OUTPUT_FNUM)
    assert hn.shape == (NUM_LAYERS, B, HIDDEN) and cn.shape == (NUM_LAYERS, B, HIDDEN)
    assert jnp.allclose(out, out_ref, rtol=1e-3, atol=1e-4)
    assert jnp.allclose(hn, hn_ref, rtol=1e-3, atol=1e-4)
    assert jnp.allclose(cn, cn_ref, rtol=1e-3, atol=1e-4)

    print("KERNEL_OK")
</pallas_src>

<mosaic_0001>
module attributes {stable_mosaic.version = 11 : i64} {
  func.func @kernel(%arg0: memref<16x4xf32, #tpu.memory_space<vmem>>, %arg1: memref<2x2x32xf32, #tpu.memory_space<vmem>>, %arg2: memref<2x2x32xf32, #tpu.memory_space<vmem>>, %arg3: memref<4x128xf32, #tpu.memory_space<vmem>>, %arg4: memref<32x128xf32, #tpu.memory_space<vmem>>, %arg5: memref<1x128xf32, #tpu.memory_space<vmem>>, %arg6: memref<32x128xf32, #tpu.memory_space<vmem>>, %arg7: memref<32x128xf32, #tpu.memory_space<vmem>>, %arg8: memref<1x128xf32, #tpu.memory_space<vmem>>, %arg9: memref<32x4xf32, #tpu.memory_space<vmem>>, %arg10: memref<1x4xf32, #tpu.memory_space<vmem>>, %arg11: memref<16x4xf32, #tpu.memory_space<vmem>>, %arg12: memref<2x2x32xf32, #tpu.memory_space<vmem>>, %arg13: memref<2x2x32xf32, #tpu.memory_space<vmem>>) attributes {dimension_semantics = [], scalar_prefetch = 0 : i64, scratch_operands = 0 : i64, tpu.core_type = #tpu.core_type<tc>} {
    %c0 = arith.constant 0 : index
    %c0_0 = arith.constant 0 : index
    %0 = vector.load %arg3[%c0, %c0_0] : memref<4x128xf32, #tpu.memory_space<vmem>>, vector<4x128xf32>
    %c0_1 = arith.constant 0 : index
    %c0_2 = arith.constant 0 : index
    %1 = vector.load %arg6[%c0_1, %c0_2] : memref<32x128xf32, #tpu.memory_space<vmem>>, vector<32x128xf32>
    %c0_3 = arith.constant 0 : index
    %c0_4 = arith.constant 0 : index
    %2 = vector.load %arg4[%c0_3, %c0_4] : memref<32x128xf32, #tpu.memory_space<vmem>>, vector<32x128xf32>
    %c0_5 = arith.constant 0 : index
    %c0_6 = arith.constant 0 : index
    %3 = vector.load %arg7[%c0_5, %c0_6] : memref<32x128xf32, #tpu.memory_space<vmem>>, vector<32x128xf32>
    %c0_7 = arith.constant 0 : index
    %c0_8 = arith.constant 0 : index
    %4 = vector.load %arg5[%c0_7, %c0_8] : memref<1x128xf32, #tpu.memory_space<vmem>>, vector<1x128xf32>
    %c0_9 = arith.constant 0 : index
    %c0_10 = arith.constant 0 : index
    %5 = vector.load %arg8[%c0_9, %c0_10] : memref<1x128xf32, #tpu.memory_space<vmem>>, vector<1x128xf32>
    %c0_11 = arith.constant 0 : index
    %c0_12 = arith.constant 0 : index
    %6 = vector.load %arg9[%c0_11, %c0_12] : memref<32x4xf32, #tpu.memory_space<vmem>>, vector<32x4xf32>
    %c0_13 = arith.constant 0 : index
    %c0_14 = arith.constant 0 : index
    %7 = vector.load %arg10[%c0_13, %c0_14] : memref<1x4xf32, #tpu.memory_space<vmem>>, vector<1x4xf32>
    %c0_15 = arith.constant 0 : index
    %c0_16 = arith.constant 0 : index
    %8 = vector.load %arg0[%c0_15, %c0_16] : memref<16x4xf32, #tpu.memory_space<vmem>>, vector<16x4xf32>
    %cst = arith.constant dense<0.000000e+00> : vector<16x128xf32>
    %9 = tpu.matmul %8, %0, %cst {dimension_numbers = #tpu.dot_dimension_numbers<[1], [0], [0], [1], [0, 0, 1, 1], [], []>} : vector<16x4xf32>, vector<4x128xf32>, vector<16x128xf32> -> vector<16x128xf32>
    %10 = vector.broadcast %4 : vector<1x128xf32> to vector<16x128xf32>
    %11 = arith.addf %9, %10 : vector<16x128xf32>
    %c0_17 = arith.constant 0 : index
    %c0_18 = arith.constant 0 : index
    %c0_19 = arith.constant 0 : index
    %12 = vector.load %arg1[%c0_17, %c0_18, %c0_19] : memref<2x2x32xf32, #tpu.memory_space<vmem>>, vector<1x2x32xf32>
    %13 = vector.shape_cast %12 : vector<1x2x32xf32> to vector<2x32xf32>
    %c1 = arith.constant 1 : index
    %c0_20 = arith.constant 0 : index
    %c0_21 = arith.constant 0 : index
    %14 = vector.load %arg1[%c1, %c0_20, %c0_21] : memref<2x2x32xf32, #tpu.memory_space<vmem>>, vector<1x2x32xf32>
    %15 = vector.shape_cast %14 : vector<1x2x32xf32> to vector<2x32xf32>
    %c0_22 = arith.constant 0 : index
    %c0_23 = arith.constant 0 : index
    %c0_24 = arith.constant 0 : index
    %16 = vector.load %arg2[%c0_22, %c0_23, %c0_24] : memref<2x2x32xf32, #tpu.memory_space<vmem>>, vector<1x2x32xf32>
    %17 = vector.shape_cast %16 : vector<1x2x32xf32> to vector<2x32xf32>
    %c1_25 = arith.constant 1 : index
    %c0_26 = arith.constant 0 : index
    %c0_27 = arith.constant 0 : index
    %18 = vector.load %arg2[%c1_25, %c0_26, %c0_27] : memref<2x2x32xf32, #tpu.memory_space<vmem>>, vector<1x2x32xf32>
    %19 = vector.shape_cast %18 : vector<1x2x32xf32> to vector<2x32xf32>
    %20 = vector.extract_strided_slice %11 {offsets = [0, 0], sizes = [2, 128], strides = [1, 1]} : vector<16x128xf32> to vector<2x128xf32>
    %cst_28 = arith.constant dense<0.000000e+00> : vector<2x128xf32>
    %21 = tpu.matmul %13, %2, %cst_28 {dimension_numbers = #tpu.dot_dimension_numbers<[1], [0], [0], [1], [0, 0, 1, 1], [], []>} : vector<2x32xf32>, vector<32x128xf32>, vector<2x128xf32> -> vector<2x128xf32>
    %22 = arith.addf %20, %21 : vector<2x128xf32>
    %23 = vector.extract_strided_slice %22 {offsets = [0, 0], sizes = [2, 32], strides = [1, 1]} : vector<2x128xf32> to vector<2x32xf32>
    %24 = arith.negf %23 : vector<2x32xf32>
    %25 = math.exp %24 : vector<2x32xf32>
    %cst_29 = arith.constant 1.000000e+00 : f32
    %26 = vector.broadcast %cst_29 : f32 to vector<2x32xf32>
    %27 = arith.addf %26, %25 : vector<2x32xf32>
    %28 = arith.divf %26, %27 : vector<2x32xf32>
    %29 = vector.extract_strided_slice %22 {offsets = [0, 32], sizes = [2, 32], strides = [1, 1]} : vector<2x128xf32> to vector<2x32xf32>
    %30 = arith.negf %29 : vector<2x32xf32>
    %31 = math.exp %30 : vector<2x32xf32>
    %cst_30 = arith.constant 1.000000e+00 : f32
    %32 = vector.broadcast %cst_30 : f32 to vector<2x32xf32>
    %33 = arith.addf %32, %31 : vector<2x32xf32>
    %34 = arith.divf %32, %33 : vector<2x32xf32>
    %35 = vector.extract_strided_slice %22 {offsets = [0, 64], sizes = [2, 32], strides = [1, 1]} : vector<2x128xf32> to vector<2x32xf32>
    %36 = math.tanh %35 : vector<2x32xf32>
    %37 = vector.extract_strided_slice %22 {offsets = [0, 96], sizes = [2, 32], strides = [1, 1]} : vector<2x128xf32> to vector<2x32xf32>
    %38 = arith.negf %37 : vector<2x32xf32>
    %39 = math.exp %38 : vector<2x32xf32>
    %cst_31 = arith.constant 1.000000e+00 : f32
    %40 = vector.broadcast %cst_31 : f32 to vector<2x32xf32>
    %41 = arith.addf %40, %39 : vector<2x32xf32>
    %42 = arith.divf %40, %41 : vector<2x32xf32>
    %43 = arith.mulf %34, %17 : vector<2x32xf32>
    %44 = arith.mulf %28, %36 : vector<2x32xf32>
    %45 = arith.addf %43, %44 : vector<2x32xf32>
    %46 = math.tanh %45 : vector<2x32xf32>
    %47 = arith.mulf %42, %46 : vector<2x32xf32>
    %48 = vector.extract_strided_slice %11 {offsets = [2, 0], sizes = [2, 128], strides = [1, 1]} : vector<16x128xf32> to vector<2x128xf32>
    %cst_32 = arith.constant dense<0.000000e+00> : vector<2x128xf32>
    %49 = tpu.matmul %47, %2, %cst_32 {dimension_numbers = #tpu.dot_dimension_numbers<[1], [0], [0], [1], [0, 0, 1, 1], [], []>} : vector<2x32xf32>, vector<32x128xf32>, vector<2x128xf32> -> vector<2x128xf32>
    %50 = arith.addf %48, %49 : vector<2x128xf32>
    %51 = vector.extract_strided_slice %50 {offsets = [0, 0], sizes = [2, 32], strides = [1, 1]} : vector<2x128xf32> to vector<2x32xf32>
    %52 = arith.negf %51 : vector<2x32xf32>
    %53 = math.exp %52 : vector<2x32xf32>
    %cst_33 = arith.constant 1.000000e+00 : f32
    %54 = vector.broadcast %cst_33 : f32 to vector<2x32xf32>
    %55 = arith.addf %54, %53 : vector<2x32xf32>
    %56 = arith.divf %54, %55 : vector<2x32xf32>
    %57 = vector.extract_strided_slice %50 {offsets = [0, 32], sizes = [2, 32], strides = [1, 1]} : vector<2x128xf32> to vector<2x32xf32>
    %58 = arith.negf %57 : vector<2x32xf32>
    %59 = math.exp %58 : vector<2x32xf32>
    %cst_34 = arith.constant 1.000000e+00 : f32
    %60 = vector.broadcast %cst_34 : f32 to vector<2x32xf32>
    %61 = arith.addf %60, %59 : vector<2x32xf32>
    %62 = arith.divf %60, %61 : vector<2x32xf32>
    %63 = vector.extract_strided_slice %50 {offsets = [0, 64], sizes = [2, 32], strides = [1, 1]} : vector<2x128xf32> to vector<2x32xf32>
    %64 = math.tanh %63 : vector<2x32xf32>
    %65 = vector.extract_strided_slice %50 {offsets = [0, 96], sizes = [2, 32], strides = [1, 1]} : vector<2x128xf32> to vector<2x32xf32>
    %66 = arith.negf %65 : vector<2x32xf32>
    %67 = math.exp %66 : vector<2x32xf32>
    %cst_35 = arith.constant 1.000000e+00 : f32
    %68 = vector.broadcast %cst_35 : f32 to vector<2x32xf32>
    %69 = arith.addf %68, %67 : vector<2x32xf32>
    %70 = arith.divf %68, %69 : vector<2x32xf32>
    %71 = arith.mulf %62, %45 : vector<2x32xf32>
    %72 = arith.mulf %56, %64 : vector<2x32xf32>
    %73 = arith.addf %71, %72 : vector<2x32xf32>
    %74 = math.tanh %73 : vector<2x32xf32>
    %75 = arith.mulf %70, %74 : vector<2x32xf32>
    %cst_36 = arith.constant dense<0.000000e+00> : vector<2x128xf32>
    %76 = tpu.matmul %47, %1, %cst_36 {dimension_numbers = #tpu.dot_dimension_numbers<[1], [0], [0], [1], [0, 0, 1, 1], [], []>} : vector<2x32xf32>, vector<32x128xf32>, vector<2x128xf32> -> vector<2x128xf32>
    %cst_37 = arith.constant dense<0.000000e+00> : vector<2x128xf32>
    %77 = tpu.matmul %15, %3, %cst_37 {dimension_numbers = #tpu.dot_dimension_numbers<[1], [0], [0], [1], [0, 0, 1, 1], [], []>} : vector<2x32xf32>, vector<32x128xf32>, vector<2x128xf32> -> vector<2x128xf32>
    %78 = arith.addf %76, %77 : vector<2x128xf32>
    %79 = vector.broadcast %5 : vector<1x128xf32> to vector<2x128xf32>
    %80 = arith.addf %78, %79 : vector<2x128xf32>
    %81 = vector.extract_strided_slice %80 {offsets = [0, 0], sizes = [2, 32], strides = [1, 1]} : vector<2x128xf32> to vector<2x32xf32>
    %82 = arith.negf %81 : vector<2x32xf32>
    %83 = math.exp %82 : vector<2x32xf32>
    %cst_38 = arith.constant 1.000000e+00 : f32
    %84 = vector.broadcast %cst_38 : f32 to vector<2x32xf32>
    %85 = arith.addf %84, %83 : vector<2x32xf32>
    %86 = arith.divf %84, %85 : vector<2x32xf32>
    %87 = vector.extract_strided_slice %80 {offsets = [0, 32], sizes = [2, 32], strides = [1, 1]} : vector<2x128xf32> to vector<2x32xf32>
    %88 = arith.negf %87 : vector<2x32xf32>
    %89 = math.exp %88 : vector<2x32xf32>
    %cst_39 = arith.constant 1.000000e+00 : f32
    %90 = vector.broadcast %cst_39 : f32 to vector<2x32xf32>
    %91 = arith.addf %90, %89 : vector<2x32xf32>
    %92 = arith.divf %90, %91 : vector<2x32xf32>
    %93 = vector.extract_strided_slice %80 {offsets = [0, 64], sizes = [2, 32], strides = [1, 1]} : vector<2x128xf32> to vector<2x32xf32>
    %94 = math.tanh %93 : vector<2x32xf32>
    %95 = vector.extract_strided_slice %80 {offsets = [0, 96], sizes = [2, 32], strides = [1, 1]} : vector<2x128xf32> to vector<2x32xf32>
    %96 = arith.negf %95 : vector<2x32xf32>
    %97 = math.exp %96 : vector<2x32xf32>
    %cst_40 = arith.constant 1.000000e+00 : f32
    %98 = vector.broadcast %cst_40 : f32 to vector<2x32xf32>
    %99 = arith.addf %98, %97 : vector<2x32xf32>
    %100 = arith.divf %98, %99 : vector<2x32xf32>
    %101 = arith.mulf %92, %19 : vector<2x32xf32>
    %102 = arith.mulf %86, %94 : vector<2x32xf32>
    %103 = arith.addf %101, %102 : vector<2x32xf32>
    %104 = math.tanh %103 : vector<2x32xf32>
    %105 = arith.mulf %100, %104 : vector<2x32xf32>
    %106 = vector.extract_strided_slice %11 {offsets = [4, 0], sizes = [2, 128], strides = [1, 1]} : vector<16x128xf32> to vector<2x128xf32>
    %cst_41 = arith.constant dense<0.000000e+00> : vector<2x128xf32>
    %107 = tpu.matmul %75, %2, %cst_41 {dimension_numbers = #tpu.dot_dimension_numbers<[1], [0], [0], [1], [0, 0, 1, 1], [], []>} : vector<2x32xf32>, vector<32x128xf32>, vector<2x128xf32> -> vector<2x128xf32>
    %108 = arith.addf %106, %107 : vector<2x128xf32>
    %109 = vector.extract_strided_slice %108 {offsets = [0, 0], sizes = [2, 32], strides = [1, 1]} : vector<2x128xf32> to vector<2x32xf32>
    %110 = arith.negf %109 : vector<2x32xf32>
    %111 = math.exp %110 : vector<2x32xf32>
    %cst_42 = arith.constant 1.000000e+00 : f32
    %112 = vector.broadcast %cst_42 : f32 to vector<2x32xf32>
    %113 = arith.addf %112, %111 : vector<2x32xf32>
    %114 = arith.divf %112, %113 : vector<2x32xf32>
    %115 = vector.extract_strided_slice %108 {offsets = [0, 32], sizes = [2, 32], strides = [1, 1]} : vector<2x128xf32> to vector<2x32xf32>
    %116 = arith.negf %115 : vector<2x32xf32>
    %117 = math.exp %116 : vector<2x32xf32>
    %cst_43 = arith.constant 1.000000e+00 : f32
    %118 = vector.broadcast %cst_43 : f32 to vector<2x32xf32>
    %119 = arith.addf %118, %117 : vector<2x32xf32>
    %120 = arith.divf %118, %119 : vector<2x32xf32>
    %121 = vector.extract_strided_slice %108 {offsets = [0, 64], sizes = [2, 32], strides = [1, 1]} : vector<2x128xf32> to vector<2x32xf32>
    %122 = math.tanh %121 : vector<2x32xf32>
    %123 = vector.extract_strided_slice %108 {offsets = [0, 96], sizes = [2, 32], strides = [1, 1]} : vector<2x128xf32> to vector<2x32xf32>
    %124 = arith.negf %123 : vector<2x32xf32>
    %125 = math.exp %124 : vector<2x32xf32>
    %cst_44 = arith.constant 1.000000e+00 : f32
    %126 = vector.broadcast %cst_44 : f32 to vector<2x32xf32>
    %127 = arith.addf %126, %125 : vector<2x32xf32>
    %128 = arith.divf %126, %127 : vector<2x32xf32>
    %129 = arith.mulf %120, %73 : vector<2x32xf32>
    %130 = arith.mulf %114, %122 : vector<2x32xf32>
    %131 = arith.addf %129, %130 : vector<2x32xf32>
    %132 = math.tanh %131 : vector<2x32xf32>
    %133 = arith.mulf %128, %132 : vector<2x32xf32>
    %cst_45 = arith.constant dense<0.000000e+00> : vector<2x128xf32>
    %134 = tpu.matmul %75, %1, %cst_45 {dimension_numbers = #tpu.dot_dimension_numbers<[1], [0], [0], [1], [0, 0, 1, 1], [], []>} : vector<2x32xf32>, vector<32x128xf32>, vector<2x128xf32> -> vector<2x128xf32>
    %cst_46 = arith.constant dense<0.000000e+00> : vector<2x128xf32>
    %135 = tpu.matmul %105, %3, %cst_46 {dimension_numbers = #tpu.dot_dimension_numbers<[1], [0], [0], [1], [0, 0, 1, 1], [], []>} : vector<2x32xf32>, vector<32x128xf32>, vector<2x128xf32> -> vector<2x128xf32>
    %136 = arith.addf %134, %135 : vector<2x128xf32>
    %137 = vector.broadcast %5 : vector<1x128xf32> to vector<2x128xf32>
    %138 = arith.addf %136, %137 : vector<2x128xf32>
    %139 = vector.extract_strided_slice %138 {offsets = [0, 0], sizes = [2, 32], strides = [1, 1]} : vector<2x128xf32> to vector<2x32xf32>
    %140 = arith.negf %139 : vector<2x32xf32>
    %141 = math.exp %140 : vector<2x32xf32>
    %cst_47 = arith.constant 1.000000e+00 : f32
    %142 = vector.broadcast %cst_47 : f32 to vector<2x32xf32>
    %143 = arith.addf %142, %141 : vector<2x32xf32>
    %144 = arith.divf %142, %143 : vector<2x32xf32>
    %145 = vector.extract_strided_slice %138 {offsets = [0, 32], sizes = [2, 32], strides = [1, 1]} : vector<2x128xf32> to vector<2x32xf32>
    %146 = arith.negf %145 : vector<2x32xf32>
    %147 = math.exp %146 : vector<2x32xf32>
    %cst_48 = arith.constant 1.000000e+00 : f32
    %148 = vector.broadcast %cst_48 : f32 to vector<2x32xf32>
    %149 = arith.addf %148, %147 : vector<2x32xf32>
    %150 = arith.divf %148, %149 : vector<2x32xf32>
    %151 = vector.extract_strided_slice %138 {offsets = [0, 64], sizes = [2, 32], strides = [1, 1]} : vector<2x128xf32> to vector<2x32xf32>
    %152 = math.tanh %151 : vector<2x32xf32>
    %153 = vector.extract_strided_slice %138 {offsets = [0, 96], sizes = [2, 32], strides = [1, 1]} : vector<2x128xf32> to vector<2x32xf32>
    %154 = arith.negf %153 : vector<2x32xf32>
    %155 = math.exp %154 : vector<2x32xf32>
    %cst_49 = arith.constant 1.000000e+00 : f32
    %156 = vector.broadcast %cst_49 : f32 to vector<2x32xf32>
    %157 = arith.addf %156, %155 : vector<2x32xf32>
    %158 = arith.divf %156, %157 : vector<2x32xf32>
    %159 = arith.mulf %150, %103 : vector<2x32xf32>
    %160 = arith.mulf %144, %152 : vector<2x32xf32>
    %161 = arith.addf %159, %160 : vector<2x32xf32>
    %162 = math.tanh %161 : vector<2x32xf32>
    %163 = arith.mulf %158, %162 : vector<2x32xf32>
    %164 = vector.extract_strided_slice %11 {offsets = [6, 0], sizes = [2, 128], strides = [1, 1]} : vector<16x128xf32> to vector<2x128xf32>
    %cst_50 = arith.constant dense<0.000000e+00> : vector<2x128xf32>
    %165 = tpu.matmul %133, %2, %cst_50 {dimension_numbers = #tpu.dot_dimension_numbers<[1], [0], [0], [1], [0, 0, 1, 1], [], []>} : vector<2x32xf32>, vector<32x128xf32>, vector<2x128xf32> -> vector<2x128xf32>
    %166 = arith.addf %164, %165 : vector<2x128xf32>
    %167 = vector.extract_strided_slice %166 {offsets = [0, 0], sizes = [2, 32], strides = [1, 1]} : vector<2x128xf32> to vector<2x32xf32>
    %168 = arith.negf %167 : vector<2x32xf32>
    %169 = math.exp %168 : vector<2x32xf32>
    %cst_51 = arith.constant 1.000000e+00 : f32
    %170 = vector.broadcast %cst_51 : f32 to vector<2x32xf32>
    %171 = arith.addf %170, %169 : vector<2x32xf32>
    %172 = arith.divf %170, %171 : vector<2x32xf32>
    %173 = vector.extract_strided_slice %166 {offsets = [0, 32], sizes = [2, 32], strides = [1, 1]} : vector<2x128xf32> to vector<2x32xf32>
    %174 = arith.negf %173 : vector<2x32xf32>
    %175 = math.exp %174 : vector<2x32xf32>
    %cst_52 = arith.constant 1.000000e+00 : f32
    %176 = vector.broadcast %cst_52 : f32 to vector<2x32xf32>
    %177 = arith.addf %176, %175 : vector<2x32xf32>
    %178 = arith.divf %176, %177 : vector<2x32xf32>
    %179 = vector.extract_strided_slice %166 {offsets = [0, 64], sizes = [2, 32], strides = [1, 1]} : vector<2x128xf32> to vector<2x32xf32>
    %180 = math.tanh %179 : vector<2x32xf32>
    %181 = vector.extract_strided_slice %166 {offsets = [0, 96], sizes = [2, 32], strides = [1, 1]} : vector<2x128xf32> to vector<2x32xf32>
    %182 = arith.negf %181 : vector<2x32xf32>
    %183 = math.exp %182 : vector<2x32xf32>
    %cst_53 = arith.constant 1.000000e+00 : f32
    %184 = vector.broadcast %cst_53 : f32 to vector<2x32xf32>
    %185 = arith.addf %184, %183 : vector<2x32xf32>
    %186 = arith.divf %184, %185 : vector<2x32xf32>
    %187 = arith.mulf %178, %131 : vector<2x32xf32>
    %188 = arith.mulf %172, %180 : vector<2x32xf32>
    %189 = arith.addf %187, %188 : vector<2x32xf32>
    %190 = math.tanh %189 : vector<2x32xf32>
    %191 = arith.mulf %186, %190 : vector<2x32xf32>
    %cst_54 = arith.constant dense<0.000000e+00> : vector<2x128xf32>
    %192 = tpu.matmul %133, %1, %cst_54 {dimension_numbers = #tpu.dot_dimension_numbers<[1], [0], [0], [1], [0, 0, 1, 1], [], []>} : vector<2x32xf32>, vector<32x128xf32>, vector<2x128xf32> -> vector<2x128xf32>
    %cst_55 = arith.constant dense<0.000000e+00> : vector<2x128xf32>
    %193 = tpu.matmul %163, %3, %cst_55 {dimension_numbers = #tpu.dot_dimension_numbers<[1], [0], [0], [1], [0, 0, 1, 1], [], []>} : vector<2x32xf32>, vector<32x128xf32>, vector<2x128xf32> -> vector<2x128xf32>
    %194 = arith.addf %192, %193 : vector<2x128xf32>
    %195 = vector.broadcast %5 : vector<1x128xf32> to vector<2x128xf32>
    %196 = arith.addf %194, %195 : vector<2x128xf32>
    %197 = vector.extract_strided_slice %196 {offsets = [0, 0], sizes = [2, 32], strides = [1, 1]} : vector<2x128xf32> to vector<2x32xf32>
    %198 = arith.negf %197 : vector<2x32xf32>
    %199 = math.exp %198 : vector<2x32xf32>
    %cst_56 = arith.constant 1.000000e+00 : f32
    %200 = vector.broadcast %cst_56 : f32 to vector<2x32xf32>
    %201 = arith.addf %200, %199 : vector<2x32xf32>
    %202 = arith.divf %200, %201 : vector<2x32xf32>
    %203 = vector.extract_strided_slice %196 {offsets = [0, 32], sizes = [2, 32], strides = [1, 1]} : vector<2x128xf32> to vector<2x32xf32>
    %204 = arith.negf %203 : vector<2x32xf32>
    %205 = math.exp %204 : vector<2x32xf32>
    %cst_57 = arith.constant 1.000000e+00 : f32
    %206 = vector.broadcast %cst_57 : f32 to vector<2x32xf32>
    %207 = arith.addf %206, %205 : vector<2x32xf32>
    %208 = arith.divf %206, %207 : vector<2x32xf32>
    %209 = vector.extract_strided_slice %196 {offsets = [0, 64], sizes = [2, 32], strides = [1, 1]} : vector<2x128xf32> to vector<2x32xf32>
    %210 = math.tanh %209 : vector<2x32xf32>
    %211 = vector.extract_strided_slice %196 {offsets = [0, 96], sizes = [2, 32], strides = [1, 1]} : vector<2x128xf32> to vector<2x32xf32>
    %212 = arith.negf %211 : vector<2x32xf32>
    %213 = math.exp %212 : vector<2x32xf32>
    %cst_58 = arith.constant 1.000000e+00 : f32
    %214 = vector.broadcast %cst_58 : f32 to vector<2x32xf32>
    %215 = arith.addf %214, %213 : vector<2x32xf32>
    %216 = arith.divf %214, %215 : vector<2x32xf32>
    %217 = arith.mulf %208, %161 : vector<2x32xf32>
    %218 = arith.mulf %202, %210 : vector<2x32xf32>
    %219 = arith.addf %217, %218 : vector<2x32xf32>
    %220 = math.tanh %219 : vector<2x32xf32>
    %221 = arith.mulf %216, %220 : vector<2x32xf32>
    %222 = vector.extract_strided_slice %11 {offsets = [8, 0], sizes = [2, 128], strides = [1, 1]} : vector<16x128xf32> to vector<2x128xf32>
    %cst_59 = arith.constant dense<0.000000e+00> : vector<2x128xf32>
    %223 = tpu.matmul %191, %2, %cst_59 {dimension_numbers = #tpu.dot_dimension_numbers<[1], [0], [0], [1], [0, 0, 1, 1], [], []>} : vector<2x32xf32>, vector<32x128xf32>, vector<2x128xf32> -> vector<2x128xf32>
    %224 = arith.addf %222, %223 : vector<2x128xf32>
    %225 = vector.extract_strided_slice %224 {offsets = [0, 0], sizes = [2, 32], strides = [1, 1]} : vector<2x128xf32> to vector<2x32xf32>
    %226 = arith.negf %225 : vector<2x32xf32>
    %227 = math.exp %226 : vector<2x32xf32>
    %cst_60 = arith.constant 1.000000e+00 : f32
    %228 = vector.broadcast %cst_60 : f32 to vector<2x32xf32>
    %229 = arith.addf %228, %227 : vector<2x32xf32>
    %230 = arith.divf %228, %229 : vector<2x32xf32>
    %231 = vector.extract_strided_slice %224 {offsets = [0, 32], sizes = [2, 32], strides = [1, 1]} : vector<2x128xf32> to vector<2x32xf32>
    %232 = arith.negf %231 : vector<2x32xf32>
    %233 = math.exp %232 : vector<2x32xf32>
    %cst_61 = arith.constant 1.000000e+00 : f32
    %234 = vector.broadcast %cst_61 : f32 to vector<2x32xf32>
    %235 = arith.addf %234, %233 : vector<2x32xf32>
    %236 = arith.divf %234, %235 : vector<2x32xf32>
    %237 = vector.extract_strided_slice %224 {offsets = [0, 64], sizes = [2, 32], strides = [1, 1]} : vector<2x128xf32> to vector<2x32xf32>
    %238 = math.tanh %237 : vector<2x32xf32>
    %239 = vector.extract_strided_slice %224 {offsets = [0, 96], sizes = [2, 32], strides = [1, 1]} : vector<2x128xf32> to vector<2x32xf32>
    %240 = arith.negf %239 : vector<2x32xf32>
    %241 = math.exp %240 : vector<2x32xf32>
    %cst_62 = arith.constant 1.000000e+00 : f32
    %242 = vector.broadcast %cst_62 : f32 to vector<2x32xf32>
    %243 = arith.addf %242, %241 : vector<2x32xf32>
    %244 = arith.divf %242, %243 : vector<2x32xf32>
    %245 = arith.mulf %236, %189 : vector<2x32xf32>
    %246 = arith.mulf %230, %238 : vector<2x32xf32>
    %247 = arith.addf %245, %246 : vector<2x32xf32>
    %248 = math.tanh %247 : vector<2x32xf32>
    %249 = arith.mulf %244, %248 : vector<2x32xf32>
    %cst_63 = arith.constant dense<0.000000e+00> : vector<2x128xf32>
    %250 = tpu.matmul %191, %1, %cst_63 {dimension_numbers = #tpu.dot_dimension_numbers<[1], [0], [0], [1], [0, 0, 1, 1], [], []>} : vector<2x32xf32>, vector<32x128xf32>, vector<2x128xf32> -> vector<2x128xf32>
    %cst_64 = arith.constant dense<0.000000e+00> : vector<2x128xf32>
    %251 = tpu.matmul %221, %3, %cst_64 {dimension_numbers = #tpu.dot_dimension_numbers<[1], [0], [0], [1], [0, 0, 1, 1], [], []>} : vector<2x32xf32>, vector<32x128xf32>, vector<2x128xf32> -> vector<2x128xf32>
    %252 = arith.addf %250, %251 : vector<2x128xf32>
    %253 = vector.broadcast %5 : vector<1x128xf32> to vector<2x128xf32>
    %254 = arith.addf %252, %253 : vector<2x128xf32>
    %255 = vector.extract_strided_slice %254 {offsets = [0, 0], sizes = [2, 32], strides = [1, 1]} : vector<2x128xf32> to vector<2x32xf32>
    %256 = arith.negf %255 : vector<2x32xf32>
    %257 = math.exp %256 : vector<2x32xf32>
    %cst_65 = arith.constant 1.000000e+00 : f32
    %258 = vector.broadcast %cst_65 : f32 to vector<2x32xf32>
    %259 = arith.addf %258, %257 : vector<2x32xf32>
    %260 = arith.divf %258, %259 : vector<2x32xf32>
    %261 = vector.extract_strided_slice %254 {offsets = [0, 32], sizes = [2, 32], strides = [1, 1]} : vector<2x128xf32> to vector<2x32xf32>
    %262 = arith.negf %261 : vector<2x32xf32>
    %263 = math.exp %262 : vector<2x32xf32>
    %cst_66 = arith.constant 1.000000e+00 : f32
    %264 = vector.broadcast %cst_66 : f32 to vector<2x32xf32>
    %265 = arith.addf %264, %263 : vector<2x32xf32>
    %266 = arith.divf %264, %265 : vector<2x32xf32>
    %267 = vector.extract_strided_slice %254 {offsets = [0, 64], sizes = [2, 32], strides = [1, 1]} : vector<2x128xf32> to vector<2x32xf32>
    %268 = math.tanh %267 : vector<2x32xf32>
    %269 = vector.extract_strided_slice %254 {offsets = [0, 96], sizes = [2, 32], strides = [1, 1]} : vector<2x128xf32> to vector<2x32xf32>
    %270 = arith.negf %269 : vector<2x32xf32>
    %271 = math.exp %270 : vector<2x32xf32>
    %cst_67 = arith.constant 1.000000e+00 : f32
    %272 = vector.broadcast %cst_67 : f32 to vector<2x32xf32>
    %273 = arith.addf %272, %271 : vector<2x32xf32>
    %274 = arith.divf %272, %273 : vector<2x32xf32>
    %275 = arith.mulf %266, %219 : vector<2x32xf32>
    %276 = arith.mulf %260, %268 : vector<2x32xf32>
    %277 = arith.addf %275, %276 : vector<2x32xf32>
    %278 = math.tanh %277 : vector<2x32xf32>
    %279 = arith.mulf %274, %278 : vector<2x32xf32>
    %280 = vector.extract_strided_slice %11 {offsets = [10, 0], sizes = [2, 128], strides = [1, 1]} : vector<16x128xf32> to vector<2x128xf32>
    %cst_68 = arith.constant dense<0.000000e+00> : vector<2x128xf32>
    %281 = tpu.matmul %249, %2, %cst_68 {dimension_numbers = #tpu.dot_dimension_numbers<[1], [0], [0], [1], [0, 0, 1, 1], [], []>} : vector<2x32xf32>, vector<32x128xf32>, vector<2x128xf32> -> vector<2x128xf32>
    %282 = arith.addf %280, %281 : vector<2x128xf32>
    %283 = vector.extract_strided_slice %282 {offsets = [0, 0], sizes = [2, 32], strides = [1, 1]} : vector<2x128xf32> to vector<2x32xf32>
    %284 = arith.negf %283 : vector<2x32xf32>
    %285 = math.exp %284 : vector<2x32xf32>
    %cst_69 = arith.constant 1.000000e+00 : f32
    %286 = vector.broadcast %cst_69 : f32 to vector<2x32xf32>
    %287 = arith.addf %286, %285 : vector<2x32xf32>
    %288 = arith.divf %286, %287 : vector<2x32xf32>
    %289 = vector.extract_strided_slice %282 {offsets = [0, 32], sizes = [2, 32], strides = [1, 1]} : vector<2x128xf32> to vector<2x32xf32>
    %290 = arith.negf %289 : vector<2x32xf32>
    %291 = math.exp %290 : vector<2x32xf32>
    %cst_70 = arith.constant 1.000000e+00 : f32
    %292 = vector.broadcast %cst_70 : f32 to vector<2x32xf32>
    %293 = arith.addf %292, %291 : vector<2x32xf32>
    %294 = arith.divf %292, %293 : vector<2x32xf32>
    %295 = vector.extract_strided_slice %282 {offsets = [0, 64], sizes = [2, 32], strides = [1, 1]} : vector<2x128xf32> to vector<2x32xf32>
    %296 = math.tanh %295 : vector<2x32xf32>
    %297 = vector.extract_strided_slice %282 {offsets = [0, 96], sizes = [2, 32], strides = [1, 1]} : vector<2x128xf32> to vector<2x32xf32>
    %298 = arith.negf %297 : vector<2x32xf32>
    %299 = math.exp %298 : vector<2x32xf32>
    %cst_71 = arith.constant 1.000000e+00 : f32
    %300 = vector.broadcast %cst_71 : f32 to vector<2x32xf32>
    %301 = arith.addf %300, %299 : vector<2x32xf32>
    %302 = arith.divf %300, %301 : vector<2x32xf32>
    %303 = arith.mulf %294, %247 : vector<2x32xf32>
    %304 = arith.mulf %288, %296 : vector<2x32xf32>
    %305 = arith.addf %303, %304 : vector<2x32xf32>
    %306 = math.tanh %305 : vector<2x32xf32>
    %307 = arith.mulf %302, %306 : vector<2x32xf32>
    %cst_72 = arith.constant dense<0.000000e+00> : vector<2x128xf32>
    %308 = tpu.matmul %249, %1, %cst_72 {dimension_numbers = #tpu.dot_dimension_numbers<[1], [0], [0], [1], [0, 0, 1, 1], [], []>} : vector<2x32xf32>, vector<32x128xf32>, vector<2x128xf32> -> vector<2x128xf32>
    %cst_73 = arith.constant dense<0.000000e+00> : vector<2x128xf32>
    %309 = tpu.matmul %279, %3, %cst_73 {dimension_numbers = #tpu.dot_dimension_numbers<[1], [0], [0], [1], [0, 0, 1, 1], [], []>} : vector<2x32xf32>, vector<32x128xf32>, vector<2x128xf32> -> vector<2x128xf32>
    %310 = arith.addf %308, %309 : vector<2x128xf32>
    %311 = vector.broadcast %5 : vector<1x128xf32> to vector<2x128xf32>
    %312 = arith.addf %310, %311 : vector<2x128xf32>
    %313 = vector.extract_strided_slice %312 {offsets = [0, 0], sizes = [2, 32], strides = [1, 1]} : vector<2x128xf32> to vector<2x32xf32>
    %314 = arith.negf %313 : vector<2x32xf32>
    %315 = math.exp %314 : vector<2x32xf32>
    %cst_74 = arith.constant 1.000000e+00 : f32
    %316 = vector.broadcast %cst_74 : f32 to vector<2x32xf32>
    %317 = arith.addf %316, %315 : vector<2x32xf32>
    %318 = arith.divf %316, %317 : vector<2x32xf32>
    %319 = vector.extract_strided_slice %312 {offsets = [0, 32], sizes = [2, 32], strides = [1, 1]} : vector<2x128xf32> to vector<2x32xf32>
    %320 = arith.negf %319 : vector<2x32xf32>
    %321 = math.exp %320 : vector<2x32xf32>
    %cst_75 = arith.constant 1.000000e+00 : f32
    %322 = vector.broadcast %cst_75 : f32 to vector<2x32xf32>
    %323 = arith.addf %322, %321 : vector<2x32xf32>
    %324 = arith.divf %322, %323 : vector<2x32xf32>
    %325 = vector.extract_strided_slice %312 {offsets = [0, 64], sizes = [2, 32], strides = [1, 1]} : vector<2x128xf32> to vector<2x32xf32>
    %326 = math.tanh %325 : vector<2x32xf32>
    %327 = vector.extract_strided_slice %312 {offsets = [0, 96], sizes = [2, 32], strides = [1, 1]} : vector<2x128xf32> to vector<2x32xf32>
    %328 = arith.negf %327 : vector<2x32xf32>
    %329 = math.exp %328 : vector<2x32xf32>
    %cst_76 = arith.constant 1.000000e+00 : f32
    %330 = vector.broadcast %cst_76 : f32 to vector<2x32xf32>
    %331 = arith.addf %330, %329 : vector<2x32xf32>
    %332 = arith.divf %330, %331 : vector<2x32xf32>
    %333 = arith.mulf %324, %277 : vector<2x32xf32>
    %334 = arith.mulf %318, %326 : vector<2x32xf32>
    %335 = arith.addf %333, %334 : vector<2x32xf32>
    %336 = math.tanh %335 : vector<2x32xf32>
    %337 = arith.mulf %332, %336 : vector<2x32xf32>
    %338 = vector.extract_strided_slice %11 {offsets = [12, 0], sizes = [2, 128], strides = [1, 1]} : vector<16x128xf32> to vector<2x128xf32>
    %cst_77 = arith.constant dense<0.000000e+00> : vector<2x128xf32>
    %339 = tpu.matmul %307, %2, %cst_77 {dimension_numbers = #tpu.dot_dimension_numbers<[1], [0], [0], [1], [0, 0, 1, 1], [], []>} : vector<2x32xf32>, vector<32x128xf32>, vector<2x128xf32> -> vector<2x128xf32>
    %340 = arith.addf %338, %339 : vector<2x128xf32>
    %341 = vector.extract_strided_slice %340 {offsets = [0, 0], sizes = [2, 32], strides = [1, 1]} : vector<2x128xf32> to vector<2x32xf32>
    %342 = arith.negf %341 : vector<2x32xf32>
    %343 = math.exp %342 : vector<2x32xf32>
    %cst_78 = arith.constant 1.000000e+00 : f32
    %344 = vector.broadcast %cst_78 : f32 to vector<2x32xf32>
    %345 = arith.addf %344, %343 : vector<2x32xf32>
    %346 = arith.divf %344, %345 : vector<2x32xf32>
    %347 = vector.extract_strided_slice %340 {offsets = [0, 32], sizes = [2, 32], strides = [1, 1]} : vector<2x128xf32> to vector<2x32xf32>
    %348 = arith.negf %347 : vector<2x32xf32>
    %349 = math.exp %348 : vector<2x32xf32>
    %cst_79 = arith.constant 1.000000e+00 : f32
    %350 = vector.broadcast %cst_79 : f32 to vector<2x32xf32>
    %351 = arith.addf %350, %349 : vector<2x32xf32>
    %352 = arith.divf %350, %351 : vector<2x32xf32>
    %353 = vector.extract_strided_slice %340 {offsets = [0, 64], sizes = [2, 32], strides = [1, 1]} : vector<2x128xf32> to vector<2x32xf32>
    %354 = math.tanh %353 : vector<2x32xf32>
    %355 = vector.extract_strided_slice %340 {offsets = [0, 96], sizes = [2, 32], strides = [1, 1]} : vector<2x128xf32> to vector<2x32xf32>
    %356 = arith.negf %355 : vector<2x32xf32>
    %357 = math.exp %356 : vector<2x32xf32>
    %cst_80 = arith.constant 1.000000e+00 : f32
    %358 = vector.broadcast %cst_80 : f32 to vector<2x32xf32>
    %359 = arith.addf %358, %357 : vector<2x32xf32>
    %360 = arith.divf %358, %359 : vector<2x32xf32>
    %361 = arith.mulf %352, %305 : vector<2x32xf32>
    %362 = arith.mulf %346, %354 : vector<2x32xf32>
    %363 = arith.addf %361, %362 : vector<2x32xf32>
    %364 = math.tanh %363 : vector<2x32xf32>
    %365 = arith.mulf %360, %364 : vector<2x32xf32>
    %cst_81 = arith.constant dense<0.000000e+00> : vector<2x128xf32>
    %366 = tpu.matmul %307, %1, %cst_81 {dimension_numbers = #tpu.dot_dimension_numbers<[1], [0], [0], [1], [0, 0, 1, 1], [], []>} : vector<2x32xf32>, vector<32x128xf32>, vector<2x128xf32> -> vector<2x128xf32>
    %cst_82 = arith.constant dense<0.000000e+00> : vector<2x128xf32>
    %367 = tpu.matmul %337, %3, %cst_82 {dimension_numbers = #tpu.dot_dimension_numbers<[1], [0], [0], [1], [0, 0, 1, 1], [], []>} : vector<2x32xf32>, vector<32x128xf32>, vector<2x128xf32> -> vector<2x128xf32>
    %368 = arith.addf %366, %367 : vector<2x128xf32>
    %369 = vector.broadcast %5 : vector<1x128xf32> to vector<2x128xf32>
    %370 = arith.addf %368, %369 : vector<2x128xf32>
    %371 = vector.extract_strided_slice %370 {offsets = [0, 0], sizes = [2, 32], strides = [1, 1]} : vector<2x128xf32> to vector<2x32xf32>
    %372 = arith.negf %371 : vector<2x32xf32>
    %373 = math.exp %372 : vector<2x32xf32>
    %cst_83 = arith.constant 1.000000e+00 : f32
    %374 = vector.broadcast %cst_83 : f32 to vector<2x32xf32>
    %375 = arith.addf %374, %373 : vector<2x32xf32>
    %376 = arith.divf %374, %375 : vector<2x32xf32>
    %377 = vector.extract_strided_slice %370 {offsets = [0, 32], sizes = [2, 32], strides = [1, 1]} : vector<2x128xf32> to vector<2x32xf32>
    %378 = arith.negf %377 : vector<2x32xf32>
    %379 = math.exp %378 : vector<2x32xf32>
    %cst_84 = arith.constant 1.000000e+00 : f32
    %380 = vector.broadcast %cst_84 : f32 to vector<2x32xf32>
    %381 = arith.addf %380, %379 : vector<2x32xf32>
    %382 = arith.divf %380, %381 : vector<2x32xf32>
    %383 = vector.extract_strided_slice %370 {offsets = [0, 64], sizes = [2, 32], strides = [1, 1]} : vector<2x128xf32> to vector<2x32xf32>
    %384 = math.tanh %383 : vector<2x32xf32>
    %385 = vector.extract_strided_slice %370 {offsets = [0, 96], sizes = [2, 32], strides = [1, 1]} : vector<2x128xf32> to vector<2x32xf32>
    %386 = arith.negf %385 : vector<2x32xf32>
    %387 = math.exp %386 : vector<2x32xf32>
    %cst_85 = arith.constant 1.000000e+00 : f32
    %388 = vector.broadcast %cst_85 : f32 to vector<2x32xf32>
    %389 = arith.addf %388, %387 : vector<2x32xf32>
    %390 = arith.divf %388, %389 : vector<2x32xf32>
    %391 = arith.mulf %382, %335 : vector<2x32xf32>
    %392 = arith.mulf %376, %384 : vector<2x32xf32>
    %393 = arith.addf %391, %392 : vector<2x32xf32>
    %394 = math.tanh %393 : vector<2x32xf32>
    %395 = arith.mulf %390, %394 : vector<2x32xf32>
    %396 = vector.extract_strided_slice %11 {offsets = [14, 0], sizes = [2, 128], strides = [1, 1]} : vector<16x128xf32> to vector<2x128xf32>
    %cst_86 = arith.constant dense<0.000000e+00> : vector<2x128xf32>
    %397 = tpu.matmul %365, %2, %cst_86 {dimension_numbers = #tpu.dot_dimension_numbers<[1], [0], [0], [1], [0, 0, 1, 1], [], []>} : vector<2x32xf32>, vector<32x128xf32>, vector<2x128xf32> -> vector<2x128xf32>
    %398 = arith.addf %396, %397 : vector<2x128xf32>
    %399 = vector.extract_strided_slice %398 {offsets = [0, 0], sizes = [2, 32], strides = [1, 1]} : vector<2x128xf32> to vector<2x32xf32>
    %400 = arith.negf %399 : vector<2x32xf32>
    %401 = math.exp %400 : vector<2x32xf32>
    %cst_87 = arith.constant 1.000000e+00 : f32
    %402 = vector.broadcast %cst_87 : f32 to vector<2x32xf32>
    %403 = arith.addf %402, %401 : vector<2x32xf32>
    %404 = arith.divf %402, %403 : vector<2x32xf32>
    %405 = vector.extract_strided_slice %398 {offsets = [0, 32], sizes = [2, 32], strides = [1, 1]} : vector<2x128xf32> to vector<2x32xf32>
    %406 = arith.negf %405 : vector<2x32xf32>
    %407 = math.exp %406 : vector<2x32xf32>
    %cst_88 = arith.constant 1.000000e+00 : f32
    %408 = vector.broadcast %cst_88 : f32 to vector<2x32xf32>
    %409 = arith.addf %408, %407 : vector<2x32xf32>
    %410 = arith.divf %408, %409 : vector<2x32xf32>
    %411 = vector.extract_strided_slice %398 {offsets = [0, 64], sizes = [2, 32], strides = [1, 1]} : vector<2x128xf32> to vector<2x32xf32>
    %412 = math.tanh %411 : vector<2x32xf32>
    %413 = vector.extract_strided_slice %398 {offsets = [0, 96], sizes = [2, 32], strides = [1, 1]} : vector<2x128xf32> to vector<2x32xf32>
    %414 = arith.negf %413 : vector<2x32xf32>
    %415 = math.exp %414 : vector<2x32xf32>
    %cst_89 = arith.constant 1.000000e+00 : f32
    %416 = vector.broadcast %cst_89 : f32 to vector<2x32xf32>
    %417 = arith.addf %416, %415 : vector<2x32xf32>
    %418 = arith.divf %416, %417 : vector<2x32xf32>
    %419 = arith.mulf %410, %363 : vector<2x32xf32>
    %420 = arith.mulf %404, %412 : vector<2x32xf32>
    %421 = arith.addf %419, %420 : vector<2x32xf32>
    %422 = math.tanh %421 : vector<2x32xf32>
    %423 = arith.mulf %418, %422 : vector<2x32xf32>
    %cst_90 = arith.constant dense<0.000000e+00> : vector<2x128xf32>
    %424 = tpu.matmul %365, %1, %cst_90 {dimension_numbers = #tpu.dot_dimension_numbers<[1], [0], [0], [1], [0, 0, 1, 1], [], []>} : vector<2x32xf32>, vector<32x128xf32>, vector<2x128xf32> -> vector<2x128xf32>
    %cst_91 = arith.constant dense<0.000000e+00> : vector<2x128xf32>
    %425 = tpu.matmul %395, %3, %cst_91 {dimension_numbers = #tpu.dot_dimension_numbers<[1], [0], [0], [1], [0, 0, 1, 1], [], []>} : vector<2x32xf32>, vector<32x128xf32>, vector<2x128xf32> -> vector<2x128xf32>
    %426 = arith.addf %424, %425 : vector<2x128xf32>
    %427 = vector.broadcast %5 : vector<1x128xf32> to vector<2x128xf32>
    %428 = arith.addf %426, %427 : vector<2x128xf32>
    %429 = vector.extract_strided_slice %428 {offsets = [0, 0], sizes = [2, 32], strides = [1, 1]} : vector<2x128xf32> to vector<2x32xf32>
    %430 = arith.negf %429 : vector<2x32xf32>
    %431 = math.exp %430 : vector<2x32xf32>
    %cst_92 = arith.constant 1.000000e+00 : f32
    %432 = vector.broadcast %cst_92 : f32 to vector<2x32xf32>
    %433 = arith.addf %432, %431 : vector<2x32xf32>
    %434 = arith.divf %432, %433 : vector<2x32xf32>
    %435 = vector.extract_strided_slice %428 {offsets = [0, 32], sizes = [2, 32], strides = [1, 1]} : vector<2x128xf32> to vector<2x32xf32>
    %436 = arith.negf %435 : vector<2x32xf32>
    %437 = math.exp %436 : vector<2x32xf32>
    %cst_93 = arith.constant 1.000000e+00 : f32
    %438 = vector.broadcast %cst_93 : f32 to vector<2x32xf32>
    %439 = arith.addf %438, %437 : vector<2x32xf32>
    %440 = arith.divf %438, %439 : vector<2x32xf32>
    %441 = vector.extract_strided_slice %428 {offsets = [0, 64], sizes = [2, 32], strides = [1, 1]} : vector<2x128xf32> to vector<2x32xf32>
    %442 = math.tanh %441 : vector<2x32xf32>
    %443 = vector.extract_strided_slice %428 {offsets = [0, 96], sizes = [2, 32], strides = [1, 1]} : vector<2x128xf32> to vector<2x32xf32>
    %444 = arith.negf %443 : vector<2x32xf32>
    %445 = math.exp %444 : vector<2x32xf32>
    %cst_94 = arith.constant 1.000000e+00 : f32
    %446 = vector.broadcast %cst_94 : f32 to vector<2x32xf32>
    %447 = arith.addf %446, %445 : vector<2x32xf32>
    %448 = arith.divf %446, %447 : vector<2x32xf32>
    %449 = arith.mulf %440, %393 : vector<2x32xf32>
    %450 = arith.mulf %434, %442 : vector<2x32xf32>
    %451 = arith.addf %449, %450 : vector<2x32xf32>
    %452 = math.tanh %451 : vector<2x32xf32>
    %453 = arith.mulf %448, %452 : vector<2x32xf32>
    %cst_95 = arith.constant dense<0.000000e+00> : vector<2x128xf32>
    %454 = tpu.matmul %423, %1, %cst_95 {dimension_numbers = #tpu.dot_dimension_numbers<[1], [0], [0], [1], [0, 0, 1, 1], [], []>} : vector<2x32xf32>, vector<32x128xf32>, vector<2x128xf32> -> vector<2x128xf32>
    %cst_96 = arith.constant dense<0.000000e+00> : vector<2x128xf32>
    %455 = tpu.matmul %453, %3, %cst_96 {dimension_numbers = #tpu.dot_dimension_numbers<[1], [0], [0], [1], [0, 0, 1, 1], [], []>} : vector<2x32xf32>, vector<32x128xf32>, vector<2x128xf32> -> vector<2x128xf32>
    %456 = arith.addf %454, %455 : vector<2x128xf32>
    %457 = vector.broadcast %5 : vector<1x128xf32> to vector<2x128xf32>
    %458 = arith.addf %456, %457 : vector<2x128xf32>
    %459 = vector.extract_strided_slice %458 {offsets = [0, 0], sizes = [2, 32], strides = [1, 1]} : vector<2x128xf32> to vector<2x32xf32>
    %460 = arith.negf %459 : vector<2x32xf32>
    %461 = math.exp %460 : vector<2x32xf32>
    %cst_97 = arith.constant 1.000000e+00 : f32
    %462 = vector.broadcast %cst_97 : f32 to vector<2x32xf32>
    %463 = arith.addf %462, %461 : vector<2x32xf32>
    %464 = arith.divf %462, %463 : vector<2x32xf32>
    %465 = vector.extract_strided_slice %458 {offsets = [0, 32], sizes = [2, 32], strides = [1, 1]} : vector<2x128xf32> to vector<2x32xf32>
    %466 = arith.negf %465 : vector<2x32xf32>
    %467 = math.exp %466 : vector<2x32xf32>
    %cst_98 = arith.constant 1.000000e+00 : f32
    %468 = vector.broadcast %cst_98 : f32 to vector<2x32xf32>
    %469 = arith.addf %468, %467 : vector<2x32xf32>
    %470 = arith.divf %468, %469 : vector<2x32xf32>
    %471 = vector.extract_strided_slice %458 {offsets = [0, 64], sizes = [2, 32], strides = [1, 1]} : vector<2x128xf32> to vector<2x32xf32>
    %472 = math.tanh %471 : vector<2x32xf32>
    %473 = vector.extract_strided_slice %458 {offsets = [0, 96], sizes = [2, 32], strides = [1, 1]} : vector<2x128xf32> to vector<2x32xf32>
    %474 = arith.negf %473 : vector<2x32xf32>
    %475 = math.exp %474 : vector<2x32xf32>
    %cst_99 = arith.constant 1.000000e+00 : f32
    %476 = vector.broadcast %cst_99 : f32 to vector<2x32xf32>
    %477 = arith.addf %476, %475 : vector<2x32xf32>
    %478 = arith.divf %476, %477 : vector<2x32xf32>
    %479 = arith.mulf %470, %451 : vector<2x32xf32>
    %480 = arith.mulf %464, %472 : vector<2x32xf32>
    %481 = arith.addf %479, %480 : vector<2x32xf32>
    %482 = math.tanh %481 : vector<2x32xf32>
    %483 = arith.mulf %478, %482 : vector<2x32xf32>
    %c0_100 = arith.constant 0 : index
    %c0_101 = arith.constant 0 : index
    %c0_102 = arith.constant 0 : index
    %484 = vector.load %arg12[%c0_100, %c0_101, %c0_102] : memref<2x2x32xf32, #tpu.memory_space<vmem>>, vector<1x2x32xf32>
    %485 = vector.shape_cast %484 : vector<1x2x32xf32> to vector<2x32xf32>
    %486 = vector.shape_cast %423 : vector<2x32xf32> to vector<1x2x32xf32>
    tpu.vector_store %arg12[%c0_100, %c0_101, %c0_102], %486 {strides = array<i32>} : memref<2x2x32xf32, #tpu.memory_space<vmem>>, vector<1x2x32xf32>,
    %c0_103 = arith.constant 0 : index
    %c0_104 = arith.constant 0 : index
    %c0_105 = arith.constant 0 : index
    %487 = vector.load %arg13[%c0_103, %c0_104, %c0_105] : memref<2x2x32xf32, #tpu.memory_space<vmem>>, vector<1x2x32xf32>
    %488 = vector.shape_cast %487 : vector<1x2x32xf32> to vector<2x32xf32>
    %489 = vector.shape_cast %421 : vector<2x32xf32> to vector<1x2x32xf32>
    tpu.vector_store %arg13[%c0_103, %c0_104, %c0_105], %489 {strides = array<i32>} : memref<2x2x32xf32, #tpu.memory_space<vmem>>, vector<1x2x32xf32>,
    %c1_106 = arith.constant 1 : index
    %c0_107 = arith.constant 0 : index
    %c0_108 = arith.constant 0 : index
    %490 = vector.load %arg12[%c1_106, %c0_107, %c0_108] : memref<2x2x32xf32, #tpu.memory_space<vmem>>, vector<1x2x32xf32>
    %491 = vector.shape_cast %490 : vector<1x2x32xf32> to vector<2x32xf32>
    %492 = vector.shape_cast %483 : vector<2x32xf32> to vector<1x2x32xf32>
    tpu.vector_store %arg12[%c1_106, %c0_107, %c0_108], %492 {strides = array<i32>} : memref<2x2x32xf32, #tpu.memory_space<vmem>>, vector<1x2x32xf32>,
    %c1_109 = arith.constant 1 : index
    %c0_110 = arith.constant 0 : index
    %c0_111 = arith.constant 0 : index
    %493 = vector.load %arg13[%c1_109, %c0_110, %c0_111] : memref<2x2x32xf32, #tpu.memory_space<vmem>>, vector<1x2x32xf32>
    %494 = vector.shape_cast %493 : vector<1x2x32xf32> to vector<2x32xf32>
    %495 = vector.shape_cast %481 : vector<2x32xf32> to vector<1x2x32xf32>
    tpu.vector_store %arg13[%c1_109, %c0_110, %c0_111], %495 {strides = array<i32>} : memref<2x2x32xf32, #tpu.memory_space<vmem>>, vector<1x2x32xf32>,
    %cst_112 = arith.constant dense<0.000000e+00> : vector<2x4xf32>
    %496 = tpu.matmul %105, %6, %cst_112 {dimension_numbers = #tpu.dot_dimension_numbers<[1], [0], [0], [1], [0, 0, 1, 1], [], []>} : vector<2x32xf32>, vector<32x4xf32>, vector<2x4xf32> -> vector<2x4xf32>
    %497 = vector.broadcast %7 : vector<1x4xf32> to vector<2x4xf32>
    %498 = arith.addf %496, %497 : vector<2x4xf32>
    %c0_113 = arith.constant 0 : index
    %c0_114 = arith.constant 0 : index
    %499 = vector.load %arg11[%c0_113, %c0_114] : memref<16x4xf32, #tpu.memory_space<vmem>>, vector<2x4xf32>
    tpu.vector_store %arg11[%c0_113, %c0_114], %498 {strides = array<i32>} : memref<16x4xf32, #tpu.memory_space<vmem>>, vector<2x4xf32>,
    %cst_115 = arith.constant dense<0.000000e+00> : vector<2x4xf32>
    %500 = tpu.matmul %163, %6, %cst_115 {dimension_numbers = #tpu.dot_dimension_numbers<[1], [0], [0], [1], [0, 0, 1, 1], [], []>} : vector<2x32xf32>, vector<32x4xf32>, vector<2x4xf32> -> vector<2x4xf32>
    %501 = vector.broadcast %7 : vector<1x4xf32> to vector<2x4xf32>
    %502 = arith.addf %500, %501 : vector<2x4xf32>
    %c2 = arith.constant 2 : index
    %c0_116 = arith.constant 0 : index
    %503 = vector.load %arg11[%c2, %c0_116] : memref<16x4xf32, #tpu.memory_space<vmem>>, vector<2x4xf32>
    tpu.vector_store %arg11[%c2, %c0_116], %502 {strides = array<i32>} : memref<16x4xf32, #tpu.memory_space<vmem>>, vector<2x4xf32>,
    %cst_117 = arith.constant dense<0.000000e+00> : vector<2x4xf32>
    %504 = tpu.matmul %221, %6, %cst_117 {dimension_numbers = #tpu.dot_dimension_numbers<[1], [0], [0], [1], [0, 0, 1, 1], [], []>} : vector<2x32xf32>, vector<32x4xf32>, vector<2x4xf32> -> vector<2x4xf32>
    %505 = vector.broadcast %7 : vector<1x4xf32> to vector<2x4xf32>
    %506 = arith.addf %504, %505 : vector<2x4xf32>
    %c4 = arith.constant 4 : index
    %c0_118 = arith.constant 0 : index
    %507 = vector.load %arg11[%c4, %c0_118] : memref<16x4xf32, #tpu.memory_space<vmem>>, vector<2x4xf32>
    tpu.vector_store %arg11[%c4, %c0_118], %506 {strides = array<i32>} : memref<16x4xf32, #tpu.memory_space<vmem>>, vector<2x4xf32>,
    %cst_119 = arith.constant dense<0.000000e+00> : vector<2x4xf32>
    %508 = tpu.matmul %279, %6, %cst_119 {dimension_numbers = #tpu.dot_dimension_numbers<[1], [0], [0], [1], [0, 0, 1, 1], [], []>} : vector<2x32xf32>, vector<32x4xf32>, vector<2x4xf32> -> vector<2x4xf32>
    %509 = vector.broadcast %7 : vector<1x4xf32> to vector<2x4xf32>
    %510 = arith.addf %508, %509 : vector<2x4xf32>
    %c6 = arith.constant 6 : index
    %c0_120 = arith.constant 0 : index
    %511 = vector.load %arg11[%c6, %c0_120] : memref<16x4xf32, #tpu.memory_space<vmem>>, vector<2x4xf32>
    tpu.vector_store %arg11[%c6, %c0_120], %510 {strides = array<i32>} : memref<16x4xf32, #tpu.memory_space<vmem>>, vector<2x4xf32>,
    %cst_121 = arith.constant dense<0.000000e+00> : vector<2x4xf32>
    %512 = tpu.matmul %337, %6, %cst_121 {dimension_numbers = #tpu.dot_dimension_numbers<[1], [0], [0], [1], [0, 0, 1, 1], [], []>} : vector<2x32xf32>, vector<32x4xf32>, vector<2x4xf32> -> vector<2x4xf32>
    %513 = vector.broadcast %7 : vector<1x4xf32> to vector<2x4xf32>
    %514 = arith.addf %512, %513 : vector<2x4xf32>
    %c8 = arith.constant 8 : index
    %c0_122 = arith.constant 0 : index
    %515 = vector.load %arg11[%c8, %c0_122] : memref<16x4xf32, #tpu.memory_space<vmem>>, vector<2x4xf32>
    tpu.vector_store %arg11[%c8, %c0_122], %514 {strides = array<i32>} : memref<16x4xf32, #tpu.memory_space<vmem>>, vector<2x4xf32>,
    %cst_123 = arith.constant dense<0.000000e+00> : vector<2x4xf32>
    %516 = tpu.matmul %395, %6, %cst_123 {dimension_numbers = #tpu.dot_dimension_numbers<[1], [0], [0], [1], [0, 0, 1, 1], [], []>} : vector<2x32xf32>, vector<32x4xf32>, vector<2x4xf32> -> vector<2x4xf32>
    %517 = vector.broadcast %7 : vector<1x4xf32> to vector<2x4xf32>
    %518 = arith.addf %516, %517 : vector<2x4xf32>
    %c10 = arith.constant 10 : index
    %c0_124 = arith.constant 0 : index
    %519 = vector.load %arg11[%c10, %c0_124] : memref<16x4xf32, #tpu.memory_space<vmem>>, vector<2x4xf32>
    tpu.vector_store %arg11[%c10, %c0_124], %518 {strides = array<i32>} : memref<16x4xf32, #tpu.memory_space<vmem>>, vector<2x4xf32>,
    %cst_125 = arith.constant dense<0.000000e+00> : vector<2x4xf32>
    %520 = tpu.matmul %453, %6, %cst_125 {dimension_numbers = #tpu.dot_dimension_numbers<[1], [0], [0], [1], [0, 0, 1, 1], [], []>} : vector<2x32xf32>, vector<32x4xf32>, vector<2x4xf32> -> vector<2x4xf32>
    %521 = vector.broadcast %7 : vector<1x4xf32> to vector<2x4xf32>
    %522 = arith.addf %520, %521 : vector<2x4xf32>
    %c12 = arith.constant 12 : index
    %c0_126 = arith.constant 0 : index
    %523 = vector.load %arg11[%c12, %c0_126] : memref<16x4xf32, #tpu.memory_space<vmem>>, vector<2x4xf32>
    tpu.vector_store %arg11[%c12, %c0_126], %522 {strides = array<i32>} : memref<16x4xf32, #tpu.memory_space<vmem>>, vector<2x4xf32>,
    %cst_127 = arith.constant dense<0.000000e+00> : vector<2x4xf32>
    %524 = tpu.matmul %483, %6, %cst_127 {dimension_numbers = #tpu.dot_dimension_numbers<[1], [0], [0], [1], [0, 0, 1, 1], [], []>} : vector<2x32xf32>, vector<32x4xf32>, vector<2x4xf32> -> vector<2x4xf32>
    %525 = vector.broadcast %7 : vector<1x4xf32> to vector<2x4xf32>
    %526 = arith.addf %524, %525 : vector<2x4xf32>
    %c14 = arith.constant 14 : index
    %c0_128 = arith.constant 0 : index
    %527 = vector.load %arg11[%c14, %c0_128] : memref<16x4xf32, #tpu.memory_space<vmem>>, vector<2x4xf32>
    tpu.vector_store %arg11[%c14, %c0_128], %526 {strides = array<i32>} : memref<16x4xf32, #tpu.memory_space<vmem>>, vector<2x4xf32>,
    return
  }
}

</mosaic_0001>

<bundles_post_ra>
// kernel: lstm_forward.1
= control target key start
LH: loop header
LB: loop body
LE: loop exit
PB: predicated region body
PF: predicated region fallthrough
CT: control target
= control target key end

     0   :  { %19 = vsyncpa [#allocation3], 0  ;;  %s4806_s0 = inlined_call_operand.vmem [shape: f32[16,4], index: 0, kind: input, shape index: {}]   ;;  %s4807_s1 = inlined_call_operand.hbm [shape: f32[2,2,32], index: 1, kind: input, shape index: {}]   ;;  %s4808_s2 = inlined_call_operand.hbm [shape: f32[2,2,32], index: 2, kind: input, shape index: {}]   ;;  %s4809_s3 = inlined_call_operand.hbm [shape: f32[4,128], index: 3, kind: input, shape index: {}]   ;;  %s4810_s4 = inlined_call_operand.vmem [shape: f32[32,128], index: 4, kind: input, shape index: {}]   ;;  %s4811_s5 = inlined_call_operand.vmem [shape: f32[1,128], index: 5, kind: input, shape index: {}]   ;;  %s4812_s6 = inlined_call_operand.vmem [shape: f32[32,128], index: 6, kind: input, shape index: {}]   ;;  %s4813_s7 = inlined_call_operand.vmem [shape: f32[32,128], index: 7, kind: input, shape index: {}]   ;;  %s4814_s8 = inlined_call_operand.vmem [shape: f32[1,128], index: 8, kind: input, shape index: {}]   ;;  %s4815_s9 = inlined_call_operand.vmem [shape: f32[32,4], index: 9, kind: input, shape index: {}]   ;;  %s4816_s10 = inlined_call_operand.hbm [shape: f32[1,4], index: 10, kind: input, shape index: {}]   ;;  %s4817_s11 = inlined_call_operand.vmem [shape: f32[16,4], index: 11, kind: output, shape index: {0}]   ;;  %s4818_s12 = inlined_call_operand.hbm [shape: f32[2,2,32], index: 12, kind: output, shape index: {1}]   ;;  %s4819_s13 = inlined_call_operand.hbm [shape: f32[2,2,32], index: 13, kind: output, shape index: {2}]  }
   0x1   :  { %20 = vsyncpa [#allocation6], 0 }
   0x2   :  { %21 = vsyncpa [#allocation9], 0 }
   0x3   :  { %22 = vsyncpa [#allocation4], 0 }
   0x4   :  { %23 = vsyncpa [#allocation12], 0  ;;  %s4124_s25 = smov [#allocation5]   ;;  %s4125_s27 = smov [#allocation2]  }
   0x5   :  { %s43_s26 = sshll.u32 %s4124_s25, 4  ;;  %s31_s28 = sshll.u32 %s4125_s27, 4  ;;  %s44_s26 = int_to_ptr.vmem [resolvable:$true] %s43_s26  ;;  %s4207_s28 = int_to_ptr.vmem [resolvable:$true] %s31_s28 }
   0x6   :  { %s3982_s14 = scalar_lea.hbm %s4808_s2, 64 }
   0x7   :  { %p3983_p0 = scmp.ne.s32.totalorder %s4808_s2, %s3982_s14  ;;  %p3986_p1 = scmp.lt.u32.totalorder %s3982_s14, %s4808_s2 }
   0x9   :  { %p3988_p2 = pnand %p3986_p1, %p3983_p0 }
   0xb   :  { %3991 = shalt.err (!%p3988_p2)
}
   0xc   :  { %s3992_s19 = scalar_lea.vmem %s44_s26, 64  ;;  %p3997_p4 = scmp.lt.s32.totalorder %s44_s26, %s44_s26 }
   0xd   :  { %p3993_p3 = scmp.ne.s32.totalorder %s44_s26, %s3992_s19  ;;  %p3998_p5 = scmp.lt.s32.totalorder %s3992_s19, %s3992_s19 }
   0xf   :  { %p3999_p6 = por %p3998_p5, %p3997_p4 }
  0x11   :  { %p4000_p7 = pnand %p3999_p6, %p3993_p3 }
  0x13   :  { %4003 = shalt.err (!%p4000_p7)
}
  0x14   :  { %s4126_s20 = smov 32   ;;  %s4127_s21 = smov 2  }
  0x15   :  { %49 = dma.hbm_to_vmem [thread:$0]  %s4808_s2, 64, %s44_s26, [#allocation6], %s4126_s20, %s4126_s20, %s4127_s21  }
  0x16   :  { %s4004_s27 = scalar_lea.hbm %s4807_s1, 64 }
  0x17   :  { %p4005_p8 = scmp.ne.s32.totalorder %s4807_s1, %s4004_s27  ;;  %p4008_p9 = scmp.lt.u32.totalorder %s4004_s27, %s4807_s1 }
  0x19   :  { %p4010_p10 = pnand %p4008_p9, %p4005_p8 }
  0x1b   :  { %4013 = shalt.err (!%p4010_p10)
}
  0x1c   :  { %s4014_s16 = scalar_lea.vmem %s4207_s28, 64  ;;  %p4019_p12 = scmp.lt.s32.totalorder %s4207_s28, %s4207_s28 }
  0x1d   :  { %p4015_p11 = scmp.ne.s32.totalorder %s4207_s28, %s4014_s16  ;;  %p4020_p13 = scmp.lt.s32.totalorder %s4014_s16, %s4014_s16 }
  0x1f   :  { %p4021_p0 = por %p4020_p13, %p4019_p12 }
  0x21   :  { %p4022_p1 = pnand %p4021_p0, %p4015_p11 }
  0x23   :  { %4025 = shalt.err (!%p4022_p1)
}
  0x24   :  { %37 = dma.hbm_to_vmem [thread:$0]  %s4807_s1, 64, %s4207_s28, [#allocation3], %s4126_s20, %s4126_s20, %s4127_s21  }
  0x25   :  { %s4128_s17 = smov [#allocation7]   ;;  %s4129_s19 = smov [#allocation8]  }
  0x26   :  { %s56_s18 = sshll.u32 %s4128_s17, 4  ;;  %s78_s22 = sshll.u32 %s4129_s19, 4  ;;  %s57_s18 = int_to_ptr.vmem [resolvable:$true] %s56_s18  ;;  %s79_s22 = int_to_ptr.vmem [resolvable:$true] %s78_s22 }
  0x27   :  { %s4026_s25 = scalar_lea.hbm %s4809_s3, 64 }
  0x28   :  { %p4027_p2 = scmp.ne.s32.totalorder %s4809_s3, %s4026_s25  ;;  %p4030_p3 = scmp.lt.u32.totalorder %s4026_s25, %s4809_s3 }
  0x2a   :  { %p4032_p4 = pnand %p4030_p3, %p4027_p2 }
  0x2c   :  { %4035 = shalt.err (!%p4032_p4)
}
  0x2d   :  { %s4036_s1 = scalar_lea.vmem %s57_s18, 64  ;;  %p4041_p6 = scmp.lt.s32.totalorder %s57_s18, %s57_s18 }
  0x2e   :  { %p4037_p5 = scmp.ne.s32.totalorder %s57_s18, %s4036_s1  ;;  %p4042_p7 = scmp.lt.s32.totalorder %s4036_s1, %s4036_s1 }
  0x30   :  { %p4043_p8 = por %p4042_p7, %p4041_p6 }
  0x32   :  { %p4044_p9 = pnand %p4043_p8, %p4037_p5 }
  0x34   :  { %4047 = shalt.err (!%p4044_p9)
}
  0x35   :  { %59 = dma.hbm_to_vmem [thread:$0]  %s4809_s3, 64, %s57_s18, [#allocation6]  }
  0x36   :  { %s4048_s26 = scalar_lea.hbm %s4816_s10, 16 }
  0x37   :  { %p4049_p10 = scmp.ne.s32.totalorder %s4816_s10, %s4048_s26  ;;  %p4052_p11 = scmp.lt.u32.totalorder %s4048_s26, %s4816_s10 }
  0x39   :  { %p4054_p12 = pnand %p4052_p11, %p4049_p10 }
  0x3b   :  { %4057 = shalt.err (!%p4054_p12)
}
  0x3c   :  { %s4058_s25 = scalar_lea.vmem %s79_s22, 16  ;;  %s4062_s27 = scalar_lea.vmem %s79_s22, 32 }
  0x3d   :  { %p4059_p13 = scmp.ne.s32.totalorder %s79_s22, %s4058_s25  ;;  %p4063_p0 = scmp.lt.s32.totalorder %s79_s22, %s79_s22 }
  0x3e   :  { %p4064_p1 = scmp.lt.s32.totalorder %s4062_s27, %s4058_s25 }
  0x40   :  { %p4065_p2 = por %p4064_p1, %p4063_p0 }
  0x42   :  { %p4066_p3 = pnand %p4065_p2, %p4059_p13 }
  0x44   :  { %4069 = shalt.err (!%p4066_p3)
}
  0x45   :  { %81 = dma.hbm_to_vmem [thread:$0]  %s4816_s10, 16, %s79_s22, [#allocation9]  }
  0x46   :  { %4114 = dma.done.wait [#allocation3], 64  }
  0x47   :  { %4115 = vsyncadd [#allocation3], 4294967232 }
  0x48   :  { %4116 = dma.done.wait [#allocation6], 128  }
  0x49   :  { %4117 = vsyncadd [#allocation6], 4294967168 }
  0x4a   :  { %4118 = dma.done.wait [#allocation9], 16  }
  0x4b   :  { %4119 = vsyncadd [#allocation9], 4294967280  ;;  %v4130_v0 = vmov 0.0|0.0   ;;  %vm4131_vm0 = vmmov 0   ;;  %v4132_v1 = vmov 0.0   ;;  %vm129_vm1 = vcmask 1043456  }
  0x4c   :  { %3648 = vmatprep.subr.bf16.mxu1 %v4130_v0  ;;  %3304 = vmatprep.mubr.msk.f32.mxu1 %vm4131_vm0, %v4132_v1  ;;  %vm122_vm2 = vcmask 31744   ;;  %v99_v2 = vld [vmem:[%s4810_s4] sm:$0xff]  ;;  %v100_v3 = vld [vmem:[%s4810_s4 + $0x8] sm:$0xff]  ;;  %v101_v8 = vld [vmem:[%s4810_s4 + $0x10] sm:$0xff]  ;;  %vm214_vm3 = vcmask 261120   ;;  %s4133_s19 = smov 64  }
  0x4d   :  { %v94_v4 = vld [vmem:[#allocation7] sm:$0xf]  ;;  %v4277_v5 = vpack.c.bf16 %v100_v3, %v99_v2  ;;  %v114_v6 = vld [vmem:[%s4806_s0] sm:$0xff]  ;;  %v102_v9 = vld [vmem:[%s4810_s4 + $0x18] sm:$0xff]  ;;  %vm2534_vm4 = vcmask 25600   ;;  %s4134_s16 = smov 96  }
  0x4e   :  { %3291 = vmatprep.subr.msk.mxu0 %vm129_vm1, %v94_v4  ;;  %v115_v7 = vld [vmem:[%s4806_s0 + $0x8] sm:$0xff]  ;;  %3293 = vmatprep.mubr.msk.f32.mxu0 %vm122_vm2, %v114_v6  ;;  %v4292_v10 = vpack.c.bf16 %v102_v9, %v101_v8  ;;  %v208_v11 = vld [vmem:[#allocation2] sm:$0x3]  ;;  %v211_v21 = vld [vmem:[#allocation5] sm:$0x3]  ;;  %vm2438_vm5 = vcmask 261126  }
  0x4f   :  { %3292 = vmatpush3.msk.msra.mxu0 %vm129_vm1, %v94_v4  ;;  %3650 = vmatpush3.bf16.msra.mxu1 %v4277_v5  ;;  %v3074_v12 = vld [vmem:[%s4811_s5] ss:$0 sm:$0xff]  ;;  %v104_v34 = vld [vmem:[%s4813_s7 + $0x8] sm:$0xff]  ;;  %v105_v36 = vld [vmem:[%s4813_s7 + $0x10] sm:$0xff]  ;;  %vm2450_vm6 = vcmask 254976   ;;  %s4136_s26 = smov [#allocation11]  }
  0x50   :  { %3294 = vmatmul.mubr.msk.f32.vlgmr.msra.gmra.mrb[0].mxu0 %vm122_vm2, %v115_v7  ;;  %3651 = vmatprep.subr.bf16.mxu1 %v4130_v0  ;;  %v103_v33 = vld [vmem:[%s4813_s7] sm:$0xff]  ;;  %v106_v37 = vld [vmem:[%s4813_s7 + $0x18] sm:$0xff]  ;;  %v96_v43 = vld [vmem:[%s4812_s6 + $0x8] sm:$0xff]  ;;  %s3054_s17 = sshll.u32 %s4136_s26, 4  ;;  %s4764_s17 = int_to_ptr.vmem [resolvable:$true] %s3054_s17 }
  0x51   :  { %3654 = vmatprep.subr.bf16.mxu0 %v4130_v0  ;;  %3315 = vmatprep.mubr.msk.f32.mxu0 %vm4131_vm0, %v4132_v1  ;;  %v4328_v35 = vpack.c.bf16 %v104_v34, %v103_v33  ;;  %v4338_v38 = vpack.c.bf16 %v106_v37, %v105_v36  ;;  %v210_v39 = vld [vmem:[#allocation2 + $0x2] sm:$0x3]  ;;  %v97_v45 = vld [vmem:[%s4812_s6 + $0x10] sm:$0xff]  ;;  %v98_v46 = vld [vmem:[%s4812_s6 + $0x18] sm:$0xff] }
  0x52   :  { %3656 = vmatpush3.bf16.msra.mxu0 %v4277_v5  ;;  %v95_v42 = vld [vmem:[%s4812_s6] sm:$0xff]  ;;  %v4366_v48 = vpack.c.bf16 %v98_v46, %v97_v45 }
  0x53   :  { %3657 = vmatprep.subr.bf16.mxu0 %v4130_v0  ;;  %3653 = vmatpush3.bf16.msra.mxu1 %v4292_v10  ;;  %v4356_v44 = vpack.c.bf16 %v96_v43, %v95_v42  ;;  %v4384_v55 = vld [vmem:[%s4814_s8] ss:$0 sm:$0xff]  ;;  %v213_v62 = vld [vmem:[#allocation5 + $0x2] sm:$0x3] }
  0x54   :  { %3660 = vmatprep.subr.bf16.mxu1 %v4130_v0 }
  0x56   :  { %3659 = vmatpush3.bf16.msra.mxu0 %v4292_v10  ;;  %3305 = vmatmul.mubr.msk.f32.vlgmr.msra.gmra.mrb[0].mxu1 %vm214_vm3, %v208_v11 }
  0x57   :  { %3666 = vmatprep.subr.bf16.mxu0 %v4130_v0  ;;  %3326 = vmatprep.mubr.msk.f32.mxu1 %vm4131_vm0, %v4132_v1 }
  0x58   :  { %3662 = vmatpush3.bf16.msra.mxu1 %v4328_v35 }
  0x59   :  { %3663 = vmatprep.subr.bf16.mxu1 %v4130_v0 }
  0x5c   :  { %3665 = vmatpush3.bf16.msra.mxu1 %v4338_v38 }
  0x5d   :  { %3672 = vmatprep.subr.bf16.mxu1 %v4130_v0 }
  0x5f   :  { %3327 = vmatmul.mubr.msk.f32.vlgmr.msra.gmra.mrb[2].mxu1 %vm214_vm3, %v210_v39 }
  0x60   :  { %3674 = vmatpush3.bf16.msra.mxu1 %v4277_v5  ;;  %3348 = vmatprep.mubr.msk.f32.mxu1 %vm4131_vm0, %v4132_v1 }
  0x61   :  { %3675 = vmatprep.subr.bf16.mxu1 %v4130_v0 }
  0x64   :  { %3677 = vmatpush3.bf16.msra.mxu1 %v4292_v10 }
  0x65   :  { %3684 = vmatprep.subr.bf16.mxu1 %v4130_v0 }
 0x123   :  { %v3295_v13 = vpop.f32.mrb[0].mxu0 }
 0x124   :  { %v4310_v14 = vadd.f32 %v3295_v13, %v3074_v12  ;;  %v199_v15 = vpop.f32.mrb[1].mxu0 }
 0x125   :  { %v4312_v16 = vadd.f32 %v3074_v12, %v199_v15 }
 0x129   :  { %v284_v17 = vpop.f32.mrb[0].mxu1 }
 0x12a   :  { %v288_v18 = vadd.f32 %v284_v17, %v4312_v16  ;;  %v3306_v19 = vpop.f32.mrb[1].mxu1 }
 0x12c   :  { %3853 = vtanh.f32 %v288_v18  ;;  %v3079_v22 = vmul.f32 -1.442695, %v288_v18 }
 0x12e   :  { %3855 = vpow2.f32 %v3079_v22 }
 0x132   :  { %v492_v49 = vpop.f32.mrb[2].mxu1 }
 0x133   :  { %v3328_v50 = vpop.f32.mrb[3].mxu1 }
 0x136   :  { %v3854_v20 = vpop.eup %3853 }
 0x137   :  { %302 = vrot.lane.b32.xlu0 %v3854_v20, %s4133_s19 }
 0x138   :  { %v3856_v23 = vpop.eup %3855 }
 0x139   :  { %v292_v24 = vadd.f32 1.0, %v3856_v23 }
 0x13b   :  { %297 = vrot.lane.b32.xlu0 %v211_v21, %s4126_s20  ;;  %3857 = vrcp.f32 %v292_v24 }
 0x145   :  { %v3858_v25 = vpop.eup %3857 }
 0x1a9   :  { %v303_v26 = vpop.permute.xlu0 %302 }
 0x1aa   :  { %v305_v27 = vmul.f32 %v3858_v25, %v303_v26 }
 0x1ac   :  { %307 = vrot.lane.b32.xlu1 %v305_v27, %s4126_s20 }
 0x1ad   :  { %v298_v28 = vpop.permute.xlu0 %297 }
 0x1ae   :  { %v300_v29 = vmul.f32 %v3858_v25, %v298_v28 }
 0x21e   :  { %v308_v30 = vpop.permute.xlu1 %307 }
 0x21f   :  { %v4318_v31 = vadd.f32 %v308_v30, %v300_v29 }
 0x221   :  { %3859 = vtanh.f32 %v4318_v31  ;;  %v404_v17 = vrot.slane %v4318_v31, 6 }
 0x22b   :  { %v3860_v32 = vpop.eup %3859 }
 0x22c   :  { %313 = vrot.lane.b32.xlu1 %v3860_v32, %s4133_s19 }
 0x29e   :  { %v314_v40 = vpop.permute.xlu1 %313 }
 0x29f   :  { %v316_v41 = vmul.f32 %v3858_v25, %v314_v40 }
 0x2a1   :  { %318 = vrot.lane.b32.xlu0 %v316_v41, %s4126_s20 }
 0x313   :  { %v319_v47 = vpop.permute.xlu0 %318 }
 0x314   :  { %3316 = vmatmul.mubr.msk.f32.vlgmr.msra.gmra.mrb[2].mxu0 %vm214_vm3, %v319_v47 }
 0x315   :  { %3668 = vmatpush3.bf16.msra.mxu0 %v4356_v44  ;;  %3337 = vmatprep.mubr.msk.f32.mxu0 %vm4131_vm0, %v4132_v1 }
 0x316   :  { %3669 = vmatprep.subr.bf16.mxu0 %v4130_v0 }
 0x319   :  { %3671 = vmatpush3.bf16.msra.mxu0 %v4366_v48 }
 0x31a   :  { %3678 = vmatprep.subr.bf16.mxu0 %v4130_v0 }
 0x31c   :  { %3338 = vmatmul.mubr.msk.f32.vlgmr.msra.gmra.mrb[4].mxu0 %vm214_vm3, %v319_v47 }
 0x31d   :  { %3680 = vmatpush3.bf16.msra.mxu0 %v4328_v35  ;;  %3359 = vmatprep.mubr.msk.f32.mxu0 %vm4131_vm0, %v4132_v1 }
 0x31e   :  { %3681 = vmatprep.subr.bf16.mxu0 %v4130_v0 }
 0x321   :  { %3683 = vmatpush3.bf16.msra.mxu0 %v4338_v38 }
 0x322   :  { %3690 = vmatprep.subr.bf16.mxu0 %v4130_v0 }
 0x3e7   :  { %v388_v51 = vpop.f32.mrb[2].mxu0 }
 0x3e8   :  { %v393_v52 = vrot.slane %v388_v51, 6  ;;  %v3317_v53 = vpop.f32.mrb[3].mxu0 }
 0x3ea   :  { %v395_v54 = vadd.f32 %v393_v52, %v4312_v16 }
 0x3ec   :  { %3861 = vtanh.f32 %v395_v54  ;;  %v3081_v63 = vmul.f32 -1.442695, %v395_v54 }
 0x3ef   :  { %v562_v56 = vpop.f32.mrb[4].mxu0 }
 0x3f0   :  { %v563_v57 = vadd.f32 %v562_v56, %v492_v49  ;;  %v3339_v58 = vpop.f32.mrb[5].mxu0 }
 0x3f2   :  { %v572_v59 = vadd.f32 %v4384_v55, %v563_v57 }
 0x3f4   :  { %3863 = vtanh.f32 %v572_v59  ;;  %v3085_v2 = vmul.f32 -1.442695, %v572_v59 }
 0x3f5   :  { %3865 = vpow2.f32 %v3081_v63 }
 0x3f6   :  { %v3862_v60 = vpop.eup %3861  ;;  %3867 = vpow2.f32 %v3085_v2 }
 0x3f7   :  { %408 = vrot.lane.b32.xlu1 %v3862_v60, %s4133_s19 }
 0x3fe   :  { %v3864_v61 = vpop.eup %3863 }
 0x3ff   :  { %586 = vrot.lane.b32.xlu0 %v3864_v61, %s4133_s19  ;;  %v3866_v3 = vpop.eup %3865 }
 0x400   :  { %v399_v4 = vadd.f32 1.0, %v3866_v3  ;;  %v3868_v6 = vpop.eup %3867 }
 0x401   :  { %v576_v7 = vadd.f32 1.0, %v3868_v6 }
 0x402   :  { %3869 = vrcp.f32 %v399_v4 }
 0x403   :  { %581 = vrot.lane.b32.xlu0 %v213_v62, %s4126_s20  ;;  %3871 = vrcp.f32 %v576_v7 }
 0x40c   :  { %v3870_v8 = vpop.eup %3869 }
 0x40d   :  { %v3872_v12 = vpop.eup %3871  ;;  %v406_v18 = vmul.f32 %v3870_v8, %v404_v17 }
 0x469   :  { %v409_v9 = vpop.permute.xlu1 %408 }
 0x46a   :  { %v411_v11 = vmul.f32 %v3870_v8, %v409_v9 }
 0x46c   :  { %413 = vrot.lane.b32.xlu1 %v411_v11, %s4126_s20 }
 0x471   :  { %v587_v13 = vpop.permute.xlu0 %586 }
 0x472   :  { %v589_v15 = vmul.f32 %v3872_v12, %v587_v13 }
 0x474   :  { %591 = vrot.lane.b32.xlu1 %v589_v15, %s4126_s20 }
 0x475   :  { %v582_v21 = vpop.permute.xlu0 %581 }
 0x476   :  { %v584_v22 = vmul.f32 %v3872_v12, %v582_v21 }
 0x4de   :  { %v414_v19 = vpop.permute.xlu1 %413 }
 0x4df   :  { %v4393_v20 = vadd.f32 %v414_v19, %v406_v18 }
 0x4e1   :  { %3873 = vtanh.f32 %v4393_v20  ;;  %v689_v63 = vrot.slane %v4393_v20, 6 }
 0x4e6   :  { %v592_v23 = vpop.permute.xlu1 %591 }
 0x4e7   :  { %v4396_v24 = vadd.f32 %v592_v23, %v584_v22 }
 0x4e9   :  { %3875 = vtanh.f32 %v4396_v24 }
 0x4eb   :  { %v3874_v25 = vpop.eup %3873 }
 0x4ec   :  { %419 = vrot.lane.b32.xlu0 %v3874_v25, %s4133_s19 }
 0x4f3   :  { %v3876_v26 = vpop.eup %3875 }
 0x4f4   :  { %597 = vrot.lane.b32.xlu1 %v3876_v26, %s4133_s19 }
 0x55e   :  { %v420_v27 = vpop.permute.xlu0 %419 }
 0x55f   :  { %v422_v28 = vmul.f32 %v3870_v8, %v420_v27 }
 0x561   :  { %v602_v29 = vrot.slane %v422_v28, 2 }
 0x563   :  { %603 = vrot.lane.b32.xlu0 %v602_v29, %s4126_s20 }
 0x566   :  { %v598_v30 = vpop.permute.xlu1 %597 }
 0x567   :  { %v600_v31 = vmul.f32 %v3872_v12, %v598_v30 }
 0x569   :  { %709 = vrot.lane.b32.xlu1 %v600_v31, %s4126_s20 }
 0x5d5   :  { %v604_v32 = vpop.permute.xlu0 %603 }
 0x5d6   :  { %3349 = vmatmul.mubr.msk.f32.vlgmr.msra.gmra.mrb[4].mxu1 %vm214_vm3, %v604_v32 }
 0x5d7   :  { %3686 = vmatpush3.bf16.msra.mxu1 %v4356_v44  ;;  %3370 = vmatprep.mubr.msk.f32.mxu1 %vm4131_vm0, %v4132_v1 }
 0x5d8   :  { %3687 = vmatprep.subr.bf16.mxu1 %v4130_v0 }
 0x5db   :  { %3689 = vmatpush3.bf16.msra.mxu1 %v4366_v48  ;;  %v4409_v33 = vpop.permute.xlu1 %709 }
 0x5dc   :  { %3360 = vmatmul.mubr.msk.f32.vlgmr.msra.gmra.mrb[6].mxu0 %vm214_vm3, %v4409_v33  ;;  %3696 = vmatprep.subr.bf16.mxu1 %v4130_v0 }
 0x5dd   :  { %3692 = vmatpush3.bf16.msra.mxu0 %v4277_v5  ;;  %3381 = vmatprep.mubr.msk.f32.mxu0 %vm4131_vm0, %v4132_v1 }
 0x5de   :  { %3371 = vmatmul.mubr.msk.f32.vlgmr.msra.gmra.mrb[6].mxu1 %vm214_vm3, %v604_v32  ;;  %3693 = vmatprep.subr.bf16.mxu0 %v4130_v0 }
 0x5df   :  { %3698 = vmatpush3.bf16.msra.mxu1 %v4328_v35  ;;  %3392 = vmatprep.mubr.msk.f32.mxu1 %vm4131_vm0, %v4132_v1 }
 0x5e0   :  { %3699 = vmatprep.subr.bf16.mxu1 %v4130_v0 }
 0x5e1   :  { %3695 = vmatpush3.bf16.msra.mxu0 %v4292_v10 }
 0x5e2   :  { %3702 = vmatprep.subr.bf16.mxu0 %v4130_v0 }
 0x5e3   :  { %3701 = vmatpush3.bf16.msra.mxu1 %v4338_v38 }
 0x5e4   :  { %3708 = vmatprep.subr.bf16.mxu1 %v4130_v0 }
 0x6a9   :  { %v673_v34 = vpop.f32.mrb[4].mxu1 }
 0x6aa   :  { %v678_v36 = vrot.slane %v673_v34, 4  ;;  %v3350_v37 = vpop.f32.mrb[5].mxu1 }
 0x6ac   :  { %v680_v39 = vadd.f32 %v678_v36, %v4312_v16 }
 0x6ae   :  { %3877 = vtanh.f32 %v680_v39  ;;  %v3087_v50 = vmul.f32 -1.442695, %v680_v39 }
 0x6af   :  { %v779_v40 = vpop.f32.mrb[6].mxu0 }
 0x6b0   :  { %v3361_v41 = vpop.f32.mrb[7].mxu0 }
 0x6b1   :  { %v849_v42 = vpop.f32.mrb[6].mxu1 }
 0x6b2   :  { %v850_v43 = vadd.f32 %v849_v42, %v779_v40  ;;  %v3372_v45 = vpop.f32.mrb[7].mxu1 }
 0x6b4   :  { %v853_v46 = vadd.f32 %v4384_v55, %v850_v43 }
 0x6b6   :  { %3879 = vtanh.f32 %v853_v46  ;;  %v3090_v51 = vmul.f32 -1.442695, %v853_v46 }
 0x6b7   :  { %3881 = vpow2.f32 %v3087_v50 }
 0x6b8   :  { %v3878_v47 = vpop.eup %3877  ;;  %3883 = vpow2.f32 %v3090_v51 }
 0x6b9   :  { %693 = vrot.lane.b32.xlu0 %v3878_v47, %s4133_s19 }
 0x6c0   :  { %v3880_v49 = vpop.eup %3879 }
 0x6c1   :  { %863 = vrot.lane.b32.xlu1 %v3880_v49, %s4133_s19  ;;  %v3882_v52 = vpop.eup %3881 }
 0x6c2   :  { %v684_v53 = vadd.f32 1.0, %v3882_v52  ;;  %v3884_v54 = vpop.eup %3883 }
 0x6c3   :  { %v857_v56 = vadd.f32 1.0, %v3884_v54 }
 0x6c4   :  { %3885 = vrcp.f32 %v684_v53 }
 0x6c5   :  { %3887 = vrcp.f32 %v857_v56 }
 0x6ce   :  { %v3886_v57 = vpop.eup %3885 }
 0x6cf   :  { %v3888_v60 = vpop.eup %3887  ;;  %v691_v2 = vmul.f32 %v3886_v57, %v689_v63 }
 0x6d0   :  { %v861_v6 = vmul.f32 %v3888_v60, %v4396_v24 }
 0x72b   :  { %v694_v58 = vpop.permute.xlu0 %693 }
 0x72c   :  { %v696_v59 = vmul.f32 %v3886_v57, %v694_v58 }
 0x72e   :  { %698 = vrot.lane.b32.xlu0 %v696_v59, %s4126_s20 }
 0x733   :  { %v864_v61 = vpop.permute.xlu1 %863 }
 0x734   :  { %v866_v62 = vmul.f32 %v3888_v60, %v864_v61 }
 0x736   :  { %868 = vrot.lane.b32.xlu1 %v866_v62, %s4126_s20 }
 0x7a0   :  { %v699_v3 = vpop.permute.xlu0 %698 }
 0x7a1   :  { %v4434_v4 = vadd.f32 %v699_v3, %v691_v2 }
 0x7a3   :  { %3889 = vtanh.f32 %v4434_v4  ;;  %v966_v49 = vrot.slane %v4434_v4, 6 }
 0x7a8   :  { %v869_v7 = vpop.permute.xlu1 %868 }
 0x7a9   :  { %v4438_v8 = vadd.f32 %v869_v7, %v861_v6 }
 0x7ab   :  { %3891 = vtanh.f32 %v4438_v8 }
 0x7ad   :  { %v3890_v9 = vpop.eup %3889 }
 0x7ae   :  { %704 = vrot.lane.b32.xlu0 %v3890_v9, %s4133_s19 }
 0x7b5   :  { %v3892_v11 = vpop.eup %3891 }
 0x7b6   :  { %874 = vrot.lane.b32.xlu1 %v3892_v11, %s4133_s19 }
 0x820   :  { %v705_v12 = vpop.permute.xlu0 %704 }
 0x821   :  { %v707_v13 = vmul.f32 %v3886_v57, %v705_v12 }
 0x823   :  { %v879_v15 = vrot.slane %v707_v13, 4 }
 0x825   :  { %880 = vrot.lane.b32.xlu0 %v879_v15, %s4126_s20 }
 0x828   :  { %v875_v17 = vpop.permute.xlu1 %874 }
 0x829   :  { %v877_v18 = vmul.f32 %v3888_v60, %v875_v17 }
 0x82b   :  { %986 = vrot.lane.b32.xlu1 %v877_v18, %s4126_s20 }
 0x897   :  { %v881_v19 = vpop.permute.xlu0 %880 }
 0x898   :  { %3382 = vmatmul.mubr.msk.f32.vlgmr.msra.gmra.mrb[8].mxu0 %vm214_vm3, %v881_v19 }
 0x899   :  { %3704 = vmatpush3.bf16.msra.mxu0 %v4356_v44  ;;  %3403 = vmatprep.mubr.msk.f32.mxu0 %vm4131_vm0, %v4132_v1 }
 0x89a   :  { %3705 = vmatprep.subr.bf16.mxu0 %v4130_v0 }
 0x89d   :  { %3707 = vmatpush3.bf16.msra.mxu0 %v4366_v48  ;;  %v4451_v20 = vpop.permute.xlu1 %986 }
 0x89e   :  { %3393 = vmatmul.mubr.msk.f32.vlgmr.msra.gmra.mrb[8].mxu1 %vm214_vm3, %v4451_v20  ;;  %3714 = vmatprep.subr.bf16.mxu0 %v4130_v0 }
 0x89f   :  { %3710 = vmatpush3.bf16.msra.mxu1 %v4277_v5  ;;  %3414 = vmatprep.mubr.msk.f32.mxu1 %vm4131_vm0, %v4132_v1 }
 0x8a0   :  { %3404 = vmatmul.mubr.msk.f32.vlgmr.msra.gmra.mrb[10].mxu0 %vm214_vm3, %v881_v19  ;;  %3711 = vmatprep.subr.bf16.mxu1 %v4130_v0 }
 0x8a1   :  { %3716 = vmatpush3.bf16.msra.mxu0 %v4328_v35  ;;  %3425 = vmatprep.mubr.msk.f32.mxu0 %vm4131_vm0, %v4132_v1 }
 0x8a2   :  { %3717 = vmatprep.subr.bf16.mxu0 %v4130_v0 }
 0x8a3   :  { %3713 = vmatpush3.bf16.msra.mxu1 %v4292_v10 }
 0x8a4   :  { %3720 = vmatprep.subr.bf16.mxu1 %v4130_v0 }
 0x8a5   :  { %3719 = vmatpush3.bf16.msra.mxu0 %v4338_v38 }
 0x8a6   :  { %3726 = vmatprep.subr.bf16.mxu0 %v4130_v0 }
 0x96b   :  { %v950_v21 = vpop.f32.mrb[8].mxu0 }
 0x96c   :  { %v955_v22 = vrot.slane %v950_v21, 2  ;;  %v3383_v23 = vpop.f32.mrb[9].mxu0 }
 0x96e   :  { %v957_v24 = vadd.f32 %v955_v22, %v4312_v16 }
 0x970   :  { %3893 = vtanh.f32 %v957_v24  ;;  %v3092_v34 = vmul.f32 -1.442695, %v957_v24 }
 0x971   :  { %v1056_v25 = vpop.f32.mrb[8].mxu1 }
 0x972   :  { %v3394_v26 = vpop.f32.mrb[9].mxu1 }
 0x973   :  { %v1126_v27 = vpop.f32.mrb[10].mxu0 }
 0x974   :  { %v1127_v28 = vadd.f32 %v1126_v27, %v1056_v25  ;;  %v3405_v29 = vpop.f32.mrb[11].mxu0 }
 0x976   :  { %v1130_v30 = vadd.f32 %v4384_v55, %v1127_v28 }
 0x978   :  { %3895 = vtanh.f32 %v1130_v30  ;;  %v3095_v36 = vmul.f32 -1.442695, %v1130_v30 }
 0x979   :  { %3897 = vpow2.f32 %v3092_v34 }
 0x97a   :  { %v3894_v31 = vpop.eup %3893  ;;  %3899 = vpow2.f32 %v3095_v36 }
 0x97b   :  { %970 = vrot.lane.b32.xlu0 %v3894_v31, %s4133_s19 }
 0x982   :  { %v3896_v32 = vpop.eup %3895 }
 0x983   :  { %1140 = vrot.lane.b32.xlu1 %v3896_v32, %s4133_s19  ;;  %v3898_v16 = vpop.eup %3897 }
 0x984   :  { %v961_v37 = vadd.f32 1.0, %v3898_v16  ;;  %v3900_v39 = vpop.eup %3899 }
 0x985   :  { %v1134_v40 = vadd.f32 1.0, %v3900_v39 }
 0x986   :  { %3901 = vrcp.f32 %v961_v37 }
 0x987   :  { %3903 = vrcp.f32 %v1134_v40 }
 0x990   :  { %v3902_v41 = vpop.eup %3901 }
 0x991   :  { %v3904_v45 = vpop.eup %3903  ;;  %v968_v50 = vmul.f32 %v3902_v41, %v966_v49 }
 0x992   :  { %v1138_v53 = vmul.f32 %v3904_v45, %v4438_v8 }
 0x9ed   :  { %v971_v42 = vpop.permute.xlu0 %970 }
 0x9ee   :  { %v973_v43 = vmul.f32 %v3902_v41, %v971_v42 }
 0x9f0   :  { %975 = vrot.lane.b32.xlu0 %v973_v43, %s4126_s20 }
 0x9f5   :  { %v1141_v46 = vpop.permute.xlu1 %1140 }
 0x9f6   :  { %v1143_v47 = vmul.f32 %v3904_v45, %v1141_v46 }
 0x9f8   :  { %1145 = vrot.lane.b32.xlu1 %v1143_v47, %s4126_s20 }
 0xa62   :  { %v976_v51 = vpop.permute.xlu0 %975 }
 0xa63   :  { %v4476_v52 = vadd.f32 %v976_v51, %v968_v50 }
 0xa65   :  { %3905 = vtanh.f32 %v4476_v52  ;;  %v1240_v32 = vrot.slane %v4476_v52, 6 }
 0xa6a   :  { %v1146_v54 = vpop.permute.xlu1 %1145 }
 0xa6b   :  { %v4480_v56 = vadd.f32 %v1146_v54, %v1138_v53 }
 0xa6d   :  { %3907 = vtanh.f32 %v4480_v56 }
 0xa6f   :  { %v3906_v57 = vpop.eup %3905 }
 0xa70   :  { %981 = vrot.lane.b32.xlu0 %v3906_v57, %s4133_s19 }
 0xa77   :  { %v3908_v58 = vpop.eup %3907 }
 0xa78   :  { %1151 = vrot.lane.b32.xlu1 %v3908_v58, %s4133_s19 }
 0xae2   :  { %v982_v59 = vpop.permute.xlu0 %981 }
 0xae3   :  { %v984_v60 = vmul.f32 %v3902_v41, %v982_v59 }
 0xae5   :  { %v1156_v61 = vrot.slane %v984_v60, 6 }
 0xae7   :  { %1157 = vrot.lane.b32.xlu0 %v1156_v61, %s4126_s20 }
 0xaea   :  { %v1152_v62 = vpop.permute.xlu1 %1151 }
 0xaeb   :  { %v1154_v63 = vmul.f32 %v3904_v45, %v1152_v62 }
 0xaed   :  { %1260 = vrot.lane.b32.xlu1 %v1154_v63, %s4126_s20 }
 0xb59   :  { %v1158_v2 = vpop.permute.xlu0 %1157 }
 0xb5a   :  { %3415 = vmatmul.mubr.msk.f32.vlgmr.msra.gmra.mrb[10].mxu1 %vm214_vm3, %v1158_v2 }
 0xb5b   :  { %3722 = vmatpush3.bf16.msra.mxu1 %v4356_v44  ;;  %3436 = vmatprep.mubr.msk.f32.mxu1 %vm4131_vm0, %v4132_v1 }
 0xb5c   :  { %3723 = vmatprep.subr.bf16.mxu1 %v4130_v0 }
 0xb5f   :  { %3725 = vmatpush3.bf16.msra.mxu1 %v4366_v48  ;;  %v4493_v3 = vpop.permute.xlu1 %1260 }
 0xb60   :  { %3426 = vmatmul.mubr.msk.f32.vlgmr.msra.gmra.mrb[12].mxu0 %vm214_vm3, %v4493_v3  ;;  %3732 = vmatprep.subr.bf16.mxu1 %v4130_v0 }
 0xb61   :  { %3728 = vmatpush3.bf16.msra.mxu0 %v4277_v5  ;;  %3447 = vmatprep.mubr.msk.f32.mxu0 %vm4131_vm0, %v4132_v1 }
 0xb62   :  { %3437 = vmatmul.mubr.msk.f32.vlgmr.msra.gmra.mrb[12].mxu1 %vm214_vm3, %v1158_v2  ;;  %3729 = vmatprep.subr.bf16.mxu0 %v4130_v0 }
 0xb63   :  { %3734 = vmatpush3.bf16.msra.mxu1 %v4328_v35  ;;  %3458 = vmatprep.mubr.msk.f32.mxu1 %vm4131_vm0, %v4132_v1 }
 0xb64   :  { %3735 = vmatprep.subr.bf16.mxu1 %v4130_v0 }
 0xb65   :  { %3731 = vmatpush3.bf16.msra.mxu0 %v4292_v10 }
 0xb66   :  { %3738 = vmatprep.subr.bf16.mxu0 %v4130_v0 }
 0xb67   :  { %3737 = vmatpush3.bf16.msra.mxu1 %v4338_v38 }
 0xb68   :  { %3744 = vmatprep.subr.bf16.mxu1 %v4130_v0 }
 0xc2d   :  { %v1227_v4 = vpop.f32.mrb[10].mxu1 }
 0xc2e   :  { %v1231_v6 = vadd.f32 %v1227_v4, %v4310_v14  ;;  %v3416_v7 = vpop.f32.mrb[11].mxu1 }
 0xc30   :  { %3909 = vtanh.f32 %v1231_v6  ;;  %v3097_v19 = vmul.f32 -1.442695, %v1231_v6 }
 0xc33   :  { %v1330_v8 = vpop.f32.mrb[12].mxu0 }
 0xc34   :  { %v3427_v9 = vpop.f32.mrb[13].mxu0 }
 0xc35   :  { %v1400_v11 = vpop.f32.mrb[12].mxu1 }
 0xc36   :  { %v1401_v12 = vadd.f32 %v1400_v11, %v1330_v8  ;;  %v3438_v13 = vpop.f32.mrb[13].mxu1 }
 0xc38   :  { %v1404_v15 = vadd.f32 %v4384_v55, %v1401_v12 }
 0xc3a   :  { %v3910_v17 = vpop.eup %3909  ;;  %3911 = vtanh.f32 %v1404_v15  ;;  %v3100_v21 = vmul.f32 -1.442695, %v1404_v15 }
 0xc3b   :  { %1244 = vrot.lane.b32.xlu0 %v3910_v17, %s4133_s19  ;;  %3913 = vpow2.f32 %v3097_v19 }
 0xc3c   :  { %3915 = vpow2.f32 %v3100_v21 }
 0xc44   :  { %v3912_v18 = vpop.eup %3911 }
 0xc45   :  { %1414 = vrot.lane.b32.xlu1 %v3912_v18, %s4133_s19  ;;  %v3914_v22 = vpop.eup %3913 }
 0xc46   :  { %v1235_v23 = vadd.f32 1.0, %v3914_v22  ;;  %v3916_v24 = vpop.eup %3915 }
 0xc47   :  { %v1408_v25 = vadd.f32 1.0, %v3916_v24 }
 0xc48   :  { %3917 = vrcp.f32 %v1235_v23 }
 0xc49   :  { %3919 = vrcp.f32 %v1408_v25 }
 0xc52   :  { %v3918_v26 = vpop.eup %3917 }
 0xc53   :  { %v3920_v29 = vpop.eup %3919  ;;  %v1242_v34 = vmul.f32 %v3918_v26, %v1240_v32 }
 0xc54   :  { %v1412_v37 = vmul.f32 %v3920_v29, %v4480_v56 }
 0xcad   :  { %v1245_v27 = vpop.permute.xlu0 %1244 }
 0xcae   :  { %v1247_v28 = vmul.f32 %v3918_v26, %v1245_v27 }
 0xcb0   :  { %1249 = vrot.lane.b32.xlu0 %v1247_v28, %s4126_s20 }
 0xcb7   :  { %v1415_v30 = vpop.permute.xlu1 %1414 }
 0xcb8   :  { %v1417_v31 = vmul.f32 %v3920_v29, %v1415_v30 }
 0xcba   :  { %1419 = vrot.lane.b32.xlu1 %v1417_v31, %s4126_s20 }
 0xd22   :  { %v1250_v36 = vpop.permute.xlu0 %1249 }
 0xd23   :  { %v4518_v16 = vadd.f32 %v1250_v36, %v1242_v34 }
 0xd25   :  { %3921 = vtanh.f32 %v4518_v16  ;;  %v1516_v19 = vrot.slane %v4518_v16, 6 }
 0xd2c   :  { %v1420_v39 = vpop.permute.xlu1 %1419 }
 0xd2d   :  { %v4522_v40 = vadd.f32 %v1420_v39, %v1412_v37 }
 0xd2f   :  { %v3922_v41 = vpop.eup %3921  ;;  %3923 = vtanh.f32 %v4522_v40 }
 0xd30   :  { %1255 = vrot.lane.b32.xlu0 %v3922_v41, %s4133_s19 }
 0xd39   :  { %v3924_v42 = vpop.eup %3923 }
 0xd3a   :  { %1425 = vrot.lane.b32.xlu1 %v3924_v42, %s4133_s19 }
 0xda2   :  { %v1256_v43 = vpop.permute.xlu0 %1255 }
 0xda3   :  { %v1258_v45 = vmul.f32 %v3918_v26, %v1256_v43 }
 0xda5   :  { %1430 = vrot.lane.b32.xlu0 %v1258_v45, %s4126_s20 }
 0xdac   :  { %v1426_v46 = vpop.permute.xlu1 %1425 }
 0xdad   :  { %v1428_v47 = vmul.f32 %v3920_v29, %v1426_v46 }
 0xdaf   :  { %1536 = vrot.lane.b32.xlu1 %v1428_v47, %s4126_s20 }
 0xe17   :  { %v1431_v49 = vpop.permute.xlu0 %1430 }
 0xe18   :  { %3448 = vmatmul.mubr.msk.f32.vlgmr.msra.gmra.mrb[14].mxu0 %vm214_vm3, %v1431_v49 }
 0xe19   :  { %3740 = vmatpush3.bf16.msra.mxu0 %v4356_v44  ;;  %3469 = vmatprep.mubr.msk.f32.mxu0 %vm4131_vm0, %v4132_v1 }
 0xe1a   :  { %3741 = vmatprep.subr.bf16.mxu0 %v4130_v0 }
 0xe1d   :  { %3743 = vmatpush3.bf16.msra.mxu0 %v4366_v48 }
 0xe1e   :  { %3750 = vmatprep.subr.bf16.mxu0 %v4130_v0 }
 0xe20   :  { %3470 = vmatmul.mubr.msk.f32.vlgmr.msra.gmra.mrb[16].mxu0 %vm214_vm3, %v1431_v49 }
 0xe21   :  { %v4537_v50 = vpop.permute.xlu1 %1536  ;;  %3752 = vmatpush3.bf16.msra.mxu0 %v4328_v35  ;;  %3491 = vmatprep.mubr.msk.f32.mxu0 %vm4131_vm0, %v4132_v1 }
 0xe22   :  { %3459 = vmatmul.mubr.msk.f32.vlgmr.msra.gmra.mrb[14].mxu1 %vm214_vm3, %v4537_v50  ;;  %3753 = vmatprep.subr.bf16.mxu0 %v4130_v0 }
 0xe23   :  { %3746 = vmatpush3.bf16.msra.mxu1 %v4277_v5  ;;  %3480 = vmatprep.mubr.msk.f32.mxu1 %vm4131_vm0, %v4132_v1 }
 0xe24   :  { %3747 = vmatprep.subr.bf16.mxu1 %v4130_v0 }
 0xe25   :  { %3755 = vmatpush3.bf16.msra.mxu0 %v4338_v38 }
 0xe26   :  { %3762 = vmatprep.subr.bf16.mxu0 %v4130_v0 }
 0xe27   :  { %3749 = vmatpush3.bf16.msra.mxu1 %v4292_v10 }
 0xe28   :  { %3756 = vmatprep.subr.bf16.mxu1 %v4130_v0 }
 0xeeb   :  { %v1500_v51 = vpop.f32.mrb[14].mxu0 }
 0xeec   :  { %v1505_v52 = vrot.slane %v1500_v51, 6  ;;  %v3449_v53 = vpop.f32.mrb[15].mxu0 }
 0xeee   :  { %v1507_v54 = vadd.f32 %v1505_v52, %v4310_v14 }
 0xef0   :  { %3925 = vtanh.f32 %v1507_v54  ;;  %v3102_v2 = vmul.f32 -1.442695, %v1507_v54 }
 0xef3   :  { %v1676_v56 = vpop.f32.mrb[16].mxu0 }
 0xef4   :  { %v3471_v57 = vpop.f32.mrb[17].mxu0 }
 0xef5   :  { %v1606_v58 = vpop.f32.mrb[14].mxu1 }
 0xef6   :  { %v1677_v59 = vadd.f32 %v1676_v56, %v1606_v58  ;;  %v3460_v60 = vpop.f32.mrb[15].mxu1 }
 0xef8   :  { %v1680_v61 = vadd.f32 %v4384_v55, %v1677_v59 }
 0xefa   :  { %v3926_v62 = vpop.eup %3925  ;;  %3927 = vtanh.f32 %v1680_v61  ;;  %v3105_v4 = vmul.f32 -1.442695, %v1680_v61 }
 0xefb   :  { %1520 = vrot.lane.b32.xlu0 %v3926_v62, %s4133_s19  ;;  %3929 = vpow2.f32 %v3102_v2 }
 0xefc   :  { %3931 = vpow2.f32 %v3105_v4 }
 0xf04   :  { %v3928_v63 = vpop.eup %3927 }
 0xf05   :  { %1690 = vrot.lane.b32.xlu1 %v3928_v63, %s4133_s19  ;;  %v3930_v6 = vpop.eup %3929 }
 0xf06   :  { %v1511_v7 = vadd.f32 1.0, %v3930_v6  ;;  %v3932_v8 = vpop.eup %3931 }
 0xf07   :  { %v1684_v9 = vadd.f32 1.0, %v3932_v8 }
 0xf08   :  { %3933 = vrcp.f32 %v1511_v7 }
 0xf09   :  { %3935 = vrcp.f32 %v1684_v9 }
 0xf12   :  { %v3934_v11 = vpop.eup %3933 }
 0xf13   :  { %v3936_v15 = vpop.eup %3935  ;;  %v1518_v21 = vmul.f32 %v3934_v11, %v1516_v19 }
 0xf14   :  { %v1688_v24 = vmul.f32 %v3936_v15, %v4522_v40 }
 0xf6d   :  { %v1521_v12 = vpop.permute.xlu0 %1520 }
 0xf6e   :  { %v1523_v13 = vmul.f32 %v3934_v11, %v1521_v12 }
 0xf70   :  { %1525 = vrot.lane.b32.xlu0 %v1523_v13, %s4126_s20 }
 0xf77   :  { %v1691_v17 = vpop.permute.xlu1 %1690 }
 0xf78   :  { %v1693_v18 = vmul.f32 %v3936_v15, %v1691_v17 }
 0xf7a   :  { %1695 = vrot.lane.b32.xlu1 %v1693_v18, %s4126_s20 }
 0xfe2   :  { %v1526_v22 = vpop.permute.xlu0 %1525 }
 0xfe3   :  { %v4560_v23 = vadd.f32 %v1526_v22, %v1518_v21 }
 0xfe5   :  { %3937 = vtanh.f32 %v4560_v23  ;;  %v1793_v2 = vrot.slane %v4560_v23, 6 }
 0xfec   :  { %v1696_v25 = vpop.permute.xlu1 %1695 }
 0xfed   :  { %v4564_v26 = vadd.f32 %v1696_v25, %v1688_v24 }
 0xfef   :  { %v3938_v27 = vpop.eup %3937  ;;  %3939 = vtanh.f32 %v4564_v26 }
 0xff0   :  { %1531 = vrot.lane.b32.xlu0 %v3938_v27, %s4133_s19 }
 0xff9   :  { %v3940_v28 = vpop.eup %3939 }
 0xffa   :  { %1701 = vrot.lane.b32.xlu1 %v3940_v28, %s4133_s19 }
0x1062   :  { %v1532_v29 = vpop.permute.xlu0 %1531 }
0x1063   :  { %v1534_v30 = vmul.f32 %v3934_v11, %v1532_v29 }
0x1065   :  { %v1706_v31 = vrot.slane %v1534_v30, 2 }
0x1067   :  { %1707 = vrot.lane.b32.xlu0 %v1706_v31, %s4126_s20 }
0x106c   :  { %v1702_v32 = vpop.permute.xlu1 %1701 }
0x106d   :  { %v1704_v34 = vmul.f32 %v3936_v15, %v1702_v32 }
0x106f   :  { %1813 = vrot.lane.b32.xlu1 %v1704_v34, %s4126_s20 }
0x10d9   :  { %v1708_v36 = vpop.permute.xlu0 %1707 }
0x10da   :  { %3481 = vmatmul.mubr.msk.f32.vlgmr.msra.gmra.mrb[16].mxu1 %vm214_vm3, %v1708_v36 }
0x10db   :  { %3758 = vmatpush3.bf16.msra.mxu1 %v4356_v44  ;;  %3502 = vmatprep.mubr.msk.f32.mxu1 %vm4131_vm0, %v4132_v1 }
0x10dc   :  { %3759 = vmatprep.subr.bf16.mxu1 %v4130_v0 }
0x10df   :  { %3761 = vmatpush3.bf16.msra.mxu1 %v4366_v48 }
0x10e0   :  { %3768 = vmatprep.subr.bf16.mxu1 %v4130_v0 }
0x10e1   :  { %v4578_v16 = vpop.permute.xlu1 %1813 }
0x10e2   :  { %3492 = vmatmul.mubr.msk.f32.vlgmr.msra.gmra.mrb[18].mxu0 %vm214_vm3, %v4578_v16  ;;  %3503 = vmatmul.mubr.msk.f32.vlgmr.msra.gmra.mrb[18].mxu1 %vm214_vm3, %v1708_v36 }
0x10e3   :  { %3764 = vmatpush3.bf16.msra.mxu0 %v4277_v5  ;;  %3770 = vmatpush3.bf16.msra.mxu1 %v4328_v35 }
0x10e4   :  { %3765 = vmatprep.subr.bf16.mxu0 %v4130_v0  ;;  %3513 = vmatprep.mubr.msk.f32.mxu0 %vm4131_vm0, %v4132_v1 }
0x10e5   :  { %3771 = vmatprep.subr.bf16.mxu1 %v4130_v0  ;;  %3524 = vmatprep.mubr.msk.f32.mxu1 %vm4131_vm0, %v4132_v1 }
0x10e7   :  { %3767 = vmatpush3.bf16.msra.mxu0 %v4292_v10  ;;  %3773 = vmatpush3.bf16.msra.mxu1 %v4338_v38 }
0x10e8   :  { %3774 = vmatprep.subr.bf16.mxu0 %v4130_v0  ;;  %3780 = vmatprep.subr.bf16.mxu1 %v4130_v0 }
0x11ad   :  { %v1777_v5 = vpop.f32.mrb[16].mxu1 }
0x11ae   :  { %v1782_v37 = vrot.slane %v1777_v5, 4  ;;  %v3482_v39 = vpop.f32.mrb[17].mxu1 }
0x11b0   :  { %v1784_v40 = vadd.f32 %v1782_v37, %v4310_v14 }
0x11b2   :  { %3941 = vtanh.f32 %v1784_v40  ;;  %v3107_v51 = vmul.f32 -1.442695, %v1784_v40 }
0x11b5   :  { %v1883_v41 = vpop.f32.mrb[18].mxu0  ;;  %v1953_v42 = vpop.f32.mrb[18].mxu1 }
0x11b6   :  { %v1954_v43 = vadd.f32 %v1953_v42, %v1883_v41  ;;  %v3493_v45 = vpop.f32.mrb[19].mxu0  ;;  %v3504_v46 = vpop.f32.mrb[19].mxu1 }
0x11b8   :  { %v1957_v47 = vadd.f32 %v4384_v55, %v1954_v43 }
0x11ba   :  { %3943 = vtanh.f32 %v1957_v47  ;;  %v3110_v52 = vmul.f32 -1.442695, %v1957_v47 }
0x11bb   :  { %3945 = vpow2.f32 %v3107_v51 }
0x11bc   :  { %v3942_v10 = vpop.eup %3941  ;;  %3947 = vpow2.f32 %v3110_v52 }
0x11bd   :  { %1797 = vrot.lane.b32.xlu0 %v3942_v10, %s4133_s19 }
0x11c4   :  { %v3944_v49 = vpop.eup %3943 }
0x11c5   :  { %1967 = vrot.lane.b32.xlu1 %v3944_v49, %s4133_s19  ;;  %v3946_v53 = vpop.eup %3945 }
0x11c6   :  { %v1788_v54 = vadd.f32 1.0, %v3946_v53  ;;  %v3948_v56 = vpop.eup %3947 }
0x11c7   :  { %v1961_v57 = vadd.f32 1.0, %v3948_v56 }
0x11c8   :  { %3949 = vrcp.f32 %v1788_v54 }
0x11c9   :  { %3951 = vrcp.f32 %v1961_v57 }
0x11d2   :  { %v3950_v58 = vpop.eup %3949 }
0x11d3   :  { %v3952_v61 = vpop.eup %3951  ;;  %v1795_v4 = vmul.f32 %v3950_v58, %v1793_v2  ;;  %v111_v2 = vld [vmem:[%s4815_s9 + $0x10] sm:$0xff] }
0x11d4   :  { %v1965_v8 = vmul.f32 %v3952_v61, %v4564_v26 }
0x122f   :  { %v1798_v59 = vpop.permute.xlu0 %1797 }
0x1230   :  { %v1800_v60 = vmul.f32 %v3950_v58, %v1798_v59 }
0x1232   :  { %1802 = vrot.lane.b32.xlu0 %v1800_v60, %s4126_s20 }
0x1237   :  { %v1968_v62 = vpop.permute.xlu1 %1967 }
0x1238   :  { %v1970_v63 = vmul.f32 %v3952_v61, %v1968_v62  ;;  %v110_v62 = vld [vmem:[%s4815_s9 + $0x8] sm:$0xff] }
0x123a   :  { %1972 = vrot.lane.b32.xlu1 %v1970_v63, %s4126_s20 }
0x12a4   :  { %v1803_v6 = vpop.permute.xlu0 %1802 }
0x12a5   :  { %v4602_v7 = vadd.f32 %v1803_v6, %v1795_v4  ;;  %v112_v4 = vld [vmem:[%s4815_s9 + $0x18] sm:$0xff] }
0x12a7   :  { %3953 = vtanh.f32 %v4602_v7  ;;  %v2070_v45 = vrot.slane %v4602_v7, 6  ;;  %v3796_v7 = vpack.c.bf16 %v112_v4, %v111_v2 }
0x12ac   :  { %v1973_v9 = vpop.permute.xlu1 %1972 }
0x12ad   :  { %v4606_v11 = vadd.f32 %v1973_v9, %v1965_v8 }
0x12af   :  { %3955 = vtanh.f32 %v4606_v11 }
0x12b1   :  { %v3954_v12 = vpop.eup %3953 }
0x12b2   :  { %1808 = vrot.lane.b32.xlu0 %v3954_v12, %s4133_s19 }
0x12b9   :  { %v3956_v13 = vpop.eup %3955 }
0x12ba   :  { %1978 = vrot.lane.b32.xlu1 %v3956_v13, %s4133_s19 }
0x1324   :  { %v1809_v15 = vpop.permute.xlu0 %1808 }
0x1325   :  { %v1811_v17 = vmul.f32 %v3950_v58, %v1809_v15 }
0x1327   :  { %v1983_v18 = vrot.slane %v1811_v17, 4 }
0x1329   :  { %1984 = vrot.lane.b32.xlu0 %v1983_v18, %s4126_s20 }
0x132c   :  { %v1979_v19 = vpop.permute.xlu1 %1978 }
0x132d   :  { %v1981_v21 = vmul.f32 %v3952_v61, %v1979_v19  ;;  %v109_v61 = vld [vmem:[%s4815_s9] sm:$0xff] }
0x132e   :  { %v3793_v63 = vpack.c.bf16 %v110_v62, %v109_v61 }
0x132f   :  { %2090 = vrot.lane.b32.xlu1 %v1981_v21, %s4126_s20 }
0x139b   :  { %v1985_v22 = vpop.permute.xlu0 %1984 }
0x139c   :  { %3514 = vmatmul.mubr.msk.f32.vlgmr.msra.gmra.mrb[20].mxu0 %vm214_vm3, %v1985_v22 }
0x139d   :  { %3776 = vmatpush3.bf16.msra.mxu0 %v4356_v44  ;;  %3535 = vmatprep.mubr.msk.f32.mxu0 %vm4131_vm0, %v4132_v1 }
0x139e   :  { %3777 = vmatprep.subr.bf16.mxu0 %v4130_v0 }
0x13a1   :  { %3779 = vmatpush3.bf16.msra.mxu0 %v4366_v48  ;;  %v4619_v23 = vpop.permute.xlu1 %2090 }
0x13a2   :  { %3525 = vmatmul.mubr.msk.f32.vlgmr.msra.gmra.mrb[20].mxu1 %vm214_vm3, %v4619_v23  ;;  %3786 = vmatprep.subr.bf16.mxu0 %v4130_v0 }
0x13a3   :  { %3782 = vmatpush3.bf16.msra.mxu1 %v4328_v35  ;;  %3546 = vmatprep.mubr.msk.f32.mxu1 %vm4131_vm0, %v4132_v1 }
0x13a4   :  { %3536 = vmatmul.mubr.msk.f32.vlgmr.msra.gmra.mrb[22].mxu0 %vm214_vm3, %v1985_v22  ;;  %3783 = vmatprep.subr.bf16.mxu1 %v4130_v0 }
0x13a5   :  { %3788 = vmatpush3.bf16.msra.mxu0 %v4356_v44  ;;  %3557 = vmatprep.mubr.msk.f32.mxu0 %vm4131_vm0, %v4132_v1 }
0x13a6   :  { %3789 = vmatprep.subr.bf16.mxu0 %v4130_v0 }
0x13a7   :  { %3785 = vmatpush3.bf16.msra.mxu1 %v4338_v38 }
0x13a8   :  { %3792 = vmatprep.subr.bf16.mxu1 %v4130_v0 }
0x13a9   :  { %3791 = vmatpush3.bf16.msra.mxu0 %v4366_v48 }
0x13aa   :  { %3798 = vmatprep.subr.bf16.mxu0 %v4130_v0 }
0x146f   :  { %v2054_v35 = vpop.f32.mrb[20].mxu0 }
0x1470   :  { %v2059_v24 = vrot.slane %v2054_v35, 2  ;;  %v3515_v25 = vpop.f32.mrb[21].mxu0 }
0x1472   :  { %v2061_v26 = vadd.f32 %v2059_v24, %v4310_v14 }
0x1474   :  { %3957 = vtanh.f32 %v2061_v26  ;;  %v3112_v32 = vmul.f32 -1.442695, %v2061_v26 }
0x1475   :  { %v2160_v44 = vpop.f32.mrb[20].mxu1 }
0x1476   :  { %v3526_v27 = vpop.f32.mrb[21].mxu1 }
0x1477   :  { %v2230_v28 = vpop.f32.mrb[22].mxu0 }
0x1478   :  { %v2231_v29 = vadd.f32 %v2230_v28, %v2160_v44  ;;  %v3537_v30 = vpop.f32.mrb[23].mxu0 }
0x147a   :  { %v2234_v31 = vadd.f32 %v4384_v55, %v2231_v29 }
0x147c   :  { %3959 = vtanh.f32 %v2234_v31  ;;  %v3115_v34 = vmul.f32 -1.442695, %v2234_v31 }
0x147d   :  { %3961 = vpow2.f32 %v3112_v32 }
0x147e   :  { %v3958_v38 = vpop.eup %3957  ;;  %3963 = vpow2.f32 %v3115_v34 }
0x147f   :  { %2074 = vrot.lane.b32.xlu0 %v3958_v38, %s4133_s19 }
0x1486   :  { %v3960_v48 = vpop.eup %3959 }
0x1487   :  { %2244 = vrot.lane.b32.xlu1 %v3960_v48, %s4133_s19  ;;  %v3962_v14 = vpop.eup %3961 }
0x1488   :  { %v2065_v36 = vadd.f32 1.0, %v3962_v14  ;;  %v3964_v5 = vpop.eup %3963 }
0x1489   :  { %v2238_v37 = vadd.f32 1.0, %v3964_v5 }
0x148a   :  { %3965 = vrcp.f32 %v2065_v36 }
0x148b   :  { %3967 = vrcp.f32 %v2238_v37 }
0x1494   :  { %v3966_v39 = vpop.eup %3965 }
0x1495   :  { %v3968_v41 = vpop.eup %3967  ;;  %v2072_v46 = vmul.f32 %v3966_v39, %v2070_v45 }
0x1496   :  { %v2242_v49 = vmul.f32 %v3968_v41, %v4606_v11 }
0x14f1   :  { %v2075_v40 = vpop.permute.xlu0 %2074 }
0x14f2   :  { %v2077_v55 = vmul.f32 %v3966_v39, %v2075_v40 }
0x14f4   :  { %2079 = vrot.lane.b32.xlu0 %v2077_v55, %s4126_s20 }
0x14f9   :  { %v2245_v42 = vpop.permute.xlu1 %2244 }
0x14fa   :  { %v2247_v43 = vmul.f32 %v3968_v41, %v2245_v42 }
0x14fc   :  { %2249 = vrot.lane.b32.xlu1 %v2247_v43, %s4126_s20 }
0x1566   :  { %v2080_v47 = vpop.permute.xlu0 %2079 }
0x1567   :  { %v4644_v10 = vadd.f32 %v2080_v47, %v2072_v46 }
0x1569   :  { %3969 = vtanh.f32 %v4644_v10 }
0x156e   :  { %v2250_v51 = vpop.permute.xlu1 %2249 }
0x156f   :  { %v4648_v52 = vadd.f32 %v2250_v51, %v2242_v49 }
0x1571   :  { %3971 = vtanh.f32 %v4648_v52 }
0x1573   :  { %v3970_v53 = vpop.eup %3969 }
0x1574   :  { %2085 = vrot.lane.b32.xlu0 %v3970_v53, %s4133_s19 }
0x157b   :  { %v3972_v54 = vpop.eup %3971 }
0x157c   :  { %2255 = vrot.lane.b32.xlu1 %v3972_v54, %s4133_s19 }
0x15e6   :  { %v2086_v56 = vpop.permute.xlu0 %2085 }
0x15e7   :  { %v4653_v57 = vmul.f32 %v3966_v39, %v2086_v56 }
0x15e9   :  { %v2335_v58 = vrot.slane %v4653_v57, 6 }
0x15eb   :  { %2336 = vrot.lane.b32.xlu1 %v2335_v58, %s4126_s20 }
0x15ee   :  { %v2256_v59 = vpop.permute.xlu1 %2255 }
0x15ef   :  { %v2258_v60 = vmul.f32 %v3968_v41, %v2256_v59 }
0x15f1   :  { %2260 = vrot.lane.b32.xlu0 %v2258_v60, %s4126_s20 }
0x165d   :  { %v2337_v6 = vpop.permute.xlu1 %2336 }
0x165e   :  { %3558 = vmatmul.mubr.msk.f32.vlgmr.msra.gmra.mrb[24].mxu0 %vm214_vm3, %v2337_v6 }
0x165f   :  { %3800 = vmatpush3.bf16.msra.mxu0 %v3793_v63  ;;  %3579 = vmatprep.mubr.msk.f32.mxu0 %vm4131_vm0, %v4132_v1 }
0x1660   :  { %3801 = vmatprep.subr.bf16.mxu0 %v4130_v0 }
0x1663   :  { %v2261_v8 = vpop.permute.xlu0 %2260  ;;  %3803 = vmatpush3.bf16.msra.mxu0 %v3796_v7 }
0x1664   :  { %3547 = vmatmul.mubr.msk.f32.vlgmr.msra.gmra.mrb[22].mxu1 %vm214_vm3, %v2261_v8  ;;  %3810 = vmatprep.subr.bf16.mxu0 %v4130_v0 }
0x1665   :  { %3794 = vmatpush3.bf16.msra.mxu1 %v3793_v63  ;;  %3568 = vmatprep.mubr.msk.f32.mxu1 %vm4131_vm0, %v4132_v1 }
0x1666   :  { %3580 = vmatmul.mubr.msk.f32.vlgmr.msra.gmra.mrb[26].mxu0 %vm214_vm3, %v4451_v20  ;;  %3795 = vmatprep.subr.bf16.mxu1 %v4130_v0 }
0x1667   :  { %3812 = vmatpush3.bf16.msra.mxu0 %v3793_v63  ;;  %3601 = vmatprep.mubr.msk.f32.mxu0 %vm4131_vm0, %v4132_v1 }
0x1668   :  { %3813 = vmatprep.subr.bf16.mxu0 %v4130_v0 }
0x1669   :  { %3797 = vmatpush3.bf16.msra.mxu1 %v3796_v7 }
0x166a   :  { %3804 = vmatprep.subr.bf16.mxu1 %v4130_v0 }
0x166b   :  { %3815 = vmatpush3.bf16.msra.mxu0 %v3796_v7 }
0x166c   :  { %3569 = vmatmul.mubr.msk.f32.vlgmr.msra.gmra.mrb[24].mxu1 %vm214_vm3, %v4409_v33  ;;  %3822 = vmatprep.subr.bf16.mxu0 %v4130_v0 }
0x166d   :  { %3806 = vmatpush3.bf16.msra.mxu1 %v3793_v63  ;;  %3590 = vmatprep.mubr.msk.f32.mxu1 %vm4131_vm0, %v4132_v1 }
0x166e   :  { %3602 = vmatmul.mubr.msk.f32.vlgmr.msra.gmra.mrb[28].mxu0 %vm214_vm3, %v4537_v50  ;;  %3807 = vmatprep.subr.bf16.mxu1 %v4130_v0  ;;  %v4715_v50 = vld [vmem:[#allocation8] ss:$0 sm:$0xff] }
0x166f   :  { %3824 = vmatpush3.bf16.msra.mxu0 %v3793_v63  ;;  %3623 = vmatprep.mubr.msk.f32.mxu0 %vm4131_vm0, %v4132_v1 }
0x1670   :  { %3825 = vmatprep.subr.bf16.mxu0 %v4130_v0 }
0x1671   :  { %3809 = vmatpush3.bf16.msra.mxu1 %v3796_v7 }
0x1672   :  { %3816 = vmatprep.subr.bf16.mxu1 %v4130_v0 }
0x1673   :  { %3827 = vmatpush3.bf16.msra.mxu0 %v3796_v7 }
0x1674   :  { %3591 = vmatmul.mubr.msk.f32.vlgmr.msra.gmra.mrb[26].mxu1 %vm214_vm3, %v4493_v3  ;;  %3834 = vmatprep.subr.bf16.mxu0 %v4130_v0 }
0x1675   :  { %3818 = vmatpush3.bf16.msra.mxu1 %v3793_v63  ;;  %3612 = vmatprep.mubr.msk.f32.mxu1 %vm4131_vm0, %v4132_v1 }
0x1676   :  { %3624 = vmatmul.mubr.msk.f32.vlgmr.msra.gmra.mrb[30].mxu0 %vm214_vm3, %v4619_v23  ;;  %3819 = vmatprep.subr.bf16.mxu1 %v4130_v0 }
0x1677   :  { %3836 = vmatpush3.bf16.msra.mxu0 %v3793_v63  ;;  %3645 = vmatprep.mubr.msk.f32.mxu0 %vm4131_vm0, %v4132_v1 }
0x1678   :  { %3837 = vmatprep.subr.bf16.mxu0 %v4130_v0 }
0x1679   :  { %3821 = vmatpush3.bf16.msra.mxu1 %v3796_v7 }
0x167a   :  { %3828 = vmatprep.subr.bf16.mxu1 %v4130_v0 }
0x167b   :  { %3839 = vmatpush3.bf16.msra.mxu0 %v3796_v7 }
0x167c   :  { %3613 = vmatmul.mubr.msk.f32.vlgmr.msra.gmra.mrb[28].mxu1 %vm214_vm3, %v4578_v16  ;;  %v3981_v16 = vld [vmem:[%s4814_s8] ss:$0 sm:$0xff] }
0x167d   :  { %3830 = vmatpush3.bf16.msra.mxu1 %v3793_v63  ;;  %3634 = vmatprep.mubr.msk.f32.mxu1 %vm4131_vm0, %v4132_v1 }
0x167e   :  { %3831 = vmatprep.subr.bf16.mxu1 %v4130_v0 }
0x1681   :  { %3833 = vmatpush3.bf16.msra.mxu1 %v3796_v7 }
0x1684   :  { %3635 = vmatmul.mubr.msk.f32.vlgmr.msra.gmra.mrb[30].mxu1 %vm214_vm3, %v2261_v8 }
0x1731   :  { %v2406_v33 = vpop.f32.mrb[24].mxu0 }
0x1732   :  { %v3559_v20 = vpop.f32.mrb[25].mxu0 }
0x1737   :  { %v2330_v3 = vpop.f32.mrb[22].mxu1 }
0x1738   :  { %v2407_v9 = vadd.f32 %v2406_v33, %v2330_v3  ;;  %v3548_v11 = vpop.f32.mrb[23].mxu1 }
0x1739   :  { %v2602_v12 = vpop.f32.mrb[26].mxu0 }
0x173a   :  { %v2410_v13 = vadd.f32 %v3981_v16, %v2407_v9  ;;  %v2603_v1 = vadd.f32 %v4715_v50, %v2602_v12  ;;  %v3581_v0 = vpop.f32.mrb[27].mxu0 }
0x173c   :  { %3973 = vtanh.f32 %v2410_v13  ;;  %2606 = vst.msk [vmem:[%s4817_s11 + $0x2] sm:$0x3] %vm2534_vm4, %v2603_v1  ;;  %v3118_v32 = vmul.f32 -1.442695, %v2410_v13 }
0x173e   :  { %3975 = vpow2.f32 %v3118_v32 }
0x173f   :  { %v2530_v15 = vpop.f32.mrb[24].mxu1 }
0x1740   :  { %v2531_v17 = vadd.f32 %v4715_v50, %v2530_v15  ;;  %v3570_v18 = vpop.f32.mrb[25].mxu1 }
0x1741   :  { %v2744_v19 = vpop.f32.mrb[28].mxu0 }
0x1742   :  { %2535 = vst.msk [vmem:[%s4817_s11] sm:$0x3] %vm2534_vm4, %v2531_v17  ;;  %v2745_v21 = vadd.f32 %v4715_v50, %v2744_v19  ;;  %v3603_v22 = vpop.f32.mrb[29].mxu0 }
0x1744   :  { %2748 = vst.msk [vmem:[%s4817_s11 + $0x6] sm:$0x3] %vm2534_vm4, %v2745_v21 }
0x1746   :  { %v3974_v23 = vpop.eup %3973 }
0x1747   :  { %v2673_v35 = vpop.f32.mrb[26].mxu1  ;;  %2420 = vrot.lane.b32.xlu0 %v3974_v23, %s4133_s19 }
0x1748   :  { %v2674_v24 = vadd.f32 %v4715_v50, %v2673_v35  ;;  %v3592_v25 = vpop.f32.mrb[27].mxu1  ;;  %v3976_v34 = vpop.eup %3975 }
0x1749   :  { %v2886_v26 = vpop.f32.mrb[30].mxu0  ;;  %v2414_v14 = vadd.f32 1.0, %v3976_v34 }
0x174a   :  { %2677 = vst.msk [vmem:[%s4817_s11 + $0x4] sm:$0x3] %vm2534_vm4, %v2674_v24  ;;  %v2887_v44 = vadd.f32 %v4715_v50, %v2886_v26  ;;  %v3625_v27 = vpop.f32.mrb[31].mxu0 }
0x174b   :  { %3977 = vrcp.f32 %v2414_v14 }
0x174c   :  { %2890 = vst.msk [vmem:[%s4817_s11 + $0xa] sm:$0x3] %vm2534_vm4, %v2887_v44 }
0x174f   :  { %v2815_v28 = vpop.f32.mrb[28].mxu1 }
0x1750   :  { %v2816_v29 = vadd.f32 %v4715_v50, %v2815_v28  ;;  %v3614_v30 = vpop.f32.mrb[29].mxu1 }
0x1752   :  { %2819 = vst.msk [vmem:[%s4817_s11 + $0x8] sm:$0x3] %vm2534_vm4, %v2816_v29 }
0x1755   :  { %v3978_v36 = vpop.eup %3977 }
0x1756   :  { %v2418_v39 = vmul.f32 %v3978_v36, %v4648_v52 }
0x1757   :  { %v2957_v31 = vpop.f32.mrb[30].mxu1 }
0x1758   :  { %v2958_v38 = vadd.f32 %v4715_v50, %v2957_v31  ;;  %v3636_v48 = vpop.f32.mrb[31].mxu1 }
0x175a   :  { %2961 = vst.msk [vmem:[%s4817_s11 + $0xc] sm:$0x3] %vm2534_vm4, %v2958_v38 }
0x17b9   :  { %v2421_v5 = vpop.permute.xlu0 %2420 }
0x17ba   :  { %v2423_v37 = vmul.f32 %v3978_v36, %v2421_v5 }
0x17bc   :  { %2425 = vrot.lane.b32.xlu1 %v2423_v37, %s4126_s20 }
0x182e   :  { %v2426_v40 = vpop.permute.xlu1 %2425 }
0x182f   :  { %v2428_v55 = vadd.f32 %v2426_v40, %v2418_v39 }
0x1831   :  { %3979 = vtanh.f32 %v2428_v55 }
0x183b   :  { %v3980_v41 = vpop.eup %3979 }
0x183c   :  { %2431 = vrot.lane.b32.xlu0 %v3980_v41, %s4133_s19  ;;  %s4135_s19 = smov [#allocation10]  }
0x183d   :  { %s3042_s2 = sshll.u32 %s4135_s19, 4  ;;  %s3043_s2 = int_to_ptr.vmem [resolvable:$true] %s3042_s2 }
0x183e   :  { %s4070_s0 = scalar_lea.vmem %s3043_s2, 64  ;;  %p4075_p5 = scmp.lt.s32.totalorder %s3043_s2, %s3043_s2 }
0x183f   :  { %p4071_p4 = scmp.ne.s32.totalorder %s3043_s2, %s4070_s0  ;;  %p4076_p6 = scmp.lt.s32.totalorder %s4070_s0, %s4070_s0 }
0x1840   :  { %2435 = vrot.lane.b32.xlu0 %v4653_v57, %s4126_s20 }
0x1841   :  { %p4077_p7 = por %p4076_p6, %p4075_p5 }
0x1843   :  { %p4078_p8 = pnand %p4077_p7, %p4071_p4 }
0x1844   :  { %2453 = vrot.lane.b32.xlu0 %v2428_v55, %s4134_s16 }
0x18ae   :  { %v2432_v42 = vpop.permute.xlu0 %2431 }
0x18af   :  { %v2434_v43 = vmul.f32 %v3978_v36, %v2432_v42 }
0x18b1   :  { %2446 = vrot.lane.b32.xlu1 %v2434_v43, %s4126_s20 }
0x18b2   :  { %v2436_v45 = vpop.permute.xlu0 %2435 }
0x18b3   :  { %2439 = vst.msk [vmem:[#allocation10 - $0x6] sm:$0xc0] %vm2438_vm5, %v2436_v45 }
0x18b5   :  { %2441 = vrot.lane.b32.xlu1 %v4644_v10, %s4134_s16 }
0x18b6   :  { %v2454_v46 = vpop.permute.xlu0 %2453 }
0x18b7   :  { %2457 = vst.msk [vmem:[#allocation11 + $0x2] sm:$0x3] %vm2450_vm6, %v2454_v46 }
0x1923   :  { %v2447_v47 = vpop.permute.xlu1 %2446 }
0x1924   :  { %2451 = vst.msk [vmem:[#allocation10 + $0x2] sm:$0x3] %vm2450_vm6, %v2447_v47  ;;  %3646 = vmatmul.mubr.msk.f32.vlgmr.msra.gmra.mrb[32].mxu0 %vm214_vm3, %v2447_v47 }
0x1927   :  { %v2442_v49 = vpop.permute.xlu1 %2441 }
0x1928   :  { %2444 = vst.msk [vmem:[#allocation11 - $0x6] sm:$0xc0] %vm2438_vm5, %v2442_v49 }
0x1929   :  { %4081 = shalt.err (!%p4078_p8)
}
0x192a   :  { %s4082_s23 = scalar_lea.hbm %s4818_s12, 64 }
0x192b   :  { %p4083_p9 = scmp.ne.s32.totalorder %s4818_s12, %s4082_s23  ;;  %p4086_p10 = scmp.lt.u32.totalorder %s4082_s23, %s4818_s12 }
0x192d   :  { %p4088_p11 = pnand %p4086_p10, %p4083_p9 }
0x192f   :  { %4091 = shalt.err (!%p4088_p11)
}
0x1930   :  { %3048 = dma.vmem_to_hbm [thread:$0]  %s3043_s2, 64, %s4818_s12, [#allocation4], %s4126_s20, %s4126_s20, %s4127_s21  }
0x1931   :  { %s4092_s29 = scalar_lea.vmem %s4764_s17, 64  ;;  %p4097_p13 = scmp.lt.s32.totalorder %s4764_s17, %s4764_s17 }
0x1932   :  { %p4093_p12 = scmp.ne.s32.totalorder %s4764_s17, %s4092_s29  ;;  %p4098_p0 = scmp.lt.s32.totalorder %s4092_s29, %s4092_s29 }
0x1934   :  { %p4099_p1 = por %p4098_p0, %p4097_p13 }
0x1936   :  { %p4100_p2 = pnand %p4099_p1, %p4093_p12 }
0x1938   :  { %4103 = shalt.err (!%p4100_p2)
}
0x1939   :  { %s4104_s30 = scalar_lea.hbm %s4819_s13, 64 }
0x193a   :  { %p4105_p3 = scmp.ne.s32.totalorder %s4819_s13, %s4104_s30  ;;  %p4108_p4 = scmp.lt.u32.totalorder %s4104_s30, %s4819_s13 }
0x193c   :  { %p4110_p5 = pnand %p4108_p4, %p4105_p3 }
0x193e   :  { %4113 = shalt.err (!%p4110_p5)
}
0x193f   :  { %3060 = dma.vmem_to_hbm [thread:$0]  %s4764_s17, 64, %s4819_s13, [#allocation12], %s4126_s20, %s4126_s20, %s4127_s21  }
0x19f7   :  { %v3030_v10 = vpop.f32.mrb[32].mxu0 }
0x19f8   :  { %v3031_v51 = vadd.f32 %v4715_v50, %v3030_v10  ;;  %v3647_v52 = vpop.f32.mrb[33].mxu0 }
0x19fa   :  { %3034 = vst.msk [vmem:[%s4817_s11 + $0xe] sm:$0x3] %vm2534_vm4, %v3031_v51 }
0x19fb   :  { %4120 = dma.done.wait [#allocation4], 64  }
0x19fc   :  { %4121 = vsyncadd [#allocation4], 4294967232 }
0x19fd   :  { %4122 = dma.done.wait [#allocation12], 64  }
0x19fe   :  { %4123 = vsyncadd [#allocation12], 4294967232 }
0x19ff   :  { %3069 = vsyncpa [#allocation3], 1 }
0x1a00   :  { %3070 = vsyncpa [#allocation6], 1 }
0x1a01   :  { %3071 = vsyncpa [#allocation9], 1 }
0x1a02   :  { %3072 = vsyncpa [#allocation4], 1 }
0x1a03   :  { %3073 = vsyncpa [#allocation12], 1 }

</bundles_post_ra>
